<compile_context>
chip_gen: v5e
topology: v5e:2x2
jax: 0.10.0
libtpu: 0.0.40
codegen_flags: <defaults>
</compile_context>

<pallas_src>
import functools

import numpy as np
import jax
import jax.numpy as jnp
from jax.experimental import pallas as pl
from jax.experimental.pallas import tpu as pltpu

_TAPS = ((0, 0), (0, 1), (1, 0), (1, 1))


def _ceil8(x):
    return -(-x // 8) * 8


# ---------------------------------------------------------------------------
# Pallas kernels (per-sample blocks; grid over batch, "parallel")
# ---------------------------------------------------------------------------
def _stem12_kernel(xf_ref, m_ref, w1_ref, b1_ref, w2a_ref, b2a_ref,
                   w2b_ref, b2b_ref, xp_ref, y2_ref, *,
                   wg2, l_y1, l_h2a, l_img):
    """stem1 + maxpool + stem2a + stem2b, fully fused in VMEM.

    All activations live on a flat (rows = (h1+2)*(w1+2) padded grid,
    lanes = channels) layout; the valid data sits at grid offset (1, 1) so
    the zero ring doubles as the next stage's conv padding.  NOTE: the
    zero-ring==padding (and zero-ring==-inf for the maxpool) trick relies on
    (a) ReLU outputs >= 0 and (b) every intermediate being multiplied by the
    validity mask before its consumer's shifted-slice reads.
    """
    offs = (0, 1, wg2, wg2 + 1)

    def conv4(src, n_out, w_ref, b_ref):
        # 2x2 / stride-1 conv as 4 shifted-slice matmuls (f32 accumulation).
        k = w_ref.shape[0] // 4
        acc = jnp.zeros((n_out, w_ref.shape[1]), jnp.float32)
        for t, off in enumerate(offs):
            lhs = src[off:off + n_out, :].astype(jnp.bfloat16)
            acc = acc + jnp.dot(lhs, w_ref[t * k:(t + 1) * k, :],
                                preferred_element_type=jnp.float32)
        return acc + b_ref[...]

    # HBM block is bf16; widen once and slice the f32 value (proven layout
    # path for the odd-offset taps), re-narrowing per slice for the MXU.
    xv = xf_ref[...].astype(jnp.float32)

    # ---- stem1: 3x3/s2 conv as 4 taps over the space-to-depth input ----
    y1 = jnp.maximum(conv4(xv, l_y1, w1_ref, b1_ref), 0.0) * m_ref[0:l_y1, :]

    # ---- maxpool 2x2 / stride 1 / 'same' (zero ring acts as -inf) ----
    p = y1[0:l_img, :]
    for off in offs[1:]:
        p = jnp.maximum(p, y1[off:off + l_img, :])
    xp_ref[...] = (p * m_ref[0:l_img, :]).astype(xp_ref.dtype)

    # ---- stem2a: 2x2/s1 'same' (stays in VMEM) ----
    h = jnp.maximum(conv4(y1, l_h2a, w2a_ref, b2a_ref), 0.0) \
        * m_ref[0:l_h2a, :]

    # ---- stem2b: 2x2/s1 'same' ----
    y2 = jnp.maximum(conv4(h, l_img, w2b_ref, b2b_ref), 0.0) \
        * m_ref[0:l_img, :]
    y2_ref[...] = y2.astype(y2_ref.dtype)


def _stem34_kernel(x1_ref, x2_ref, w3a_ref, w3b_ref, b3_ref, w4_ref, b4_ref,
                   o_ref, *, wq, l_o3):
    """stem3 (concat folded into two tap-matmul groups) + stem4 epilogue."""
    offs = (0, 1, wq, wq + 1)
    k3 = w3a_ref.shape[0] // 4
    x1 = x1_ref[...].astype(jnp.float32)
    x2 = x2_ref[...].astype(jnp.float32)
    acc = jnp.zeros((l_o3, w3a_ref.shape[1]), jnp.float32)
    for t, off in enumerate(offs):
        acc = acc + jnp.dot(x1[off:off + l_o3, :].astype(jnp.bfloat16),
                            w3a_ref[t * k3:(t + 1) * k3, :],
                            preferred_element_type=jnp.float32)
        acc = acc + jnp.dot(x2[off:off + l_o3, :].astype(jnp.bfloat16),
                            w3b_ref[t * k3:(t + 1) * k3, :],
                            preferred_element_type=jnp.float32)
    h = jnp.maximum(acc + b3_ref[...], 0.0)
    y = jnp.dot(h.astype(jnp.bfloat16), w4_ref[...],
                preferred_element_type=jnp.float32)
    o_ref[...] = jnp.maximum(y + b4_ref[...], 0.0).astype(o_ref.dtype)


# ---------------------------------------------------------------------------
# BlockSpec helpers: per-sample blocks for activations, full blocks otherwise.
# ---------------------------------------------------------------------------
def _bspec(arr):
    nd = arr.ndim
    return pl.BlockSpec((None,) + tuple(arr.shape[1:]),
                        lambda i: (i,) + (0,) * (nd - 1))


def _fspec(arr):
    nd = arr.ndim
    return pl.BlockSpec(tuple(arr.shape), lambda i: (0,) * nd)


_PARALLEL = pltpu.CompilerParams(dimension_semantics=("parallel",))


# ---------------------------------------------------------------------------
# Glue helpers (cheap layout plumbing, no compute)
# ---------------------------------------------------------------------------
def _s2d(x):
    # (N, H, W, C) with even H, W -> (N, H//2, W//2, 4C); lane order (i, j, c).
    n, he, we, c = x.shape
    x = x.reshape(n, he // 2, 2, we // 2, 2, c)
    x = jnp.transpose(x, (0, 1, 3, 2, 4, 5))
    return x.reshape(n, he // 2, we // 2, 4 * c)


# ---------------------------------------------------------------------------
# Weight layout (BN scale folded in, bf16, tap-stacked, no zero-lane padding)
# ---------------------------------------------------------------------------
def _w_taps_2x2(w_hwio, scale):
    # (2,2,cin,cout) -> (4*cin, cout) bf16, row blocks ordered by tap (i, j).
    ws = w_hwio * scale[None, None, None, :]
    return jnp.concatenate([ws[i, j] for (i, j) in _TAPS],
                           axis=0).astype(jnp.bfloat16)


def _w_taps_3x3_s2(w_hwio, scale):
    # 3x3 stride-2 conv expressed as a 2x2 stride-1 conv over the
    # space-to-depth input: (3,3,cin,cout) -> (16*cin, cout) bf16,
    # row blocks ordered (tap (a,b), sub-position (i,j), cin).
    _, _, cin, cout = w_hwio.shape
    ws = w_hwio * scale[None, None, None, :]
    zero = jnp.zeros((cin, cout), jnp.float32)
    rows = []
    for (a, b) in _TAPS:
        for (i, j) in _TAPS:
            kh, kw = 2 * a + i, 2 * b + j
            rows.append(ws[kh, kw] if (kh < 3 and kw < 3) else zero)
    return jnp.concatenate(rows, axis=0).astype(jnp.bfloat16)


def _w_1x1(w_hwio, scale):
    return (w_hwio[0, 0] * scale[None, :]).astype(jnp.bfloat16)


def _bias_row(bias):
    return bias.reshape(1, -1).astype(jnp.float32)


# ---------------------------------------------------------------------------
# Parameter initialization (deterministic, synthetic; PyTorch-like layout)
# ---------------------------------------------------------------------------
def _conv_bn_params(key, cin, cout, k):
    kw_, kg, kb, km, kv = jax.random.split(key, 5)
    w_oihw = jax.random.normal(kw_, (cout, cin, k, k), jnp.float32)
    w_oihw = w_oihw * (2.0 / (cin * k * k)) ** 0.5
    w_hwio = jnp.transpose(w_oihw, (2, 3, 1, 0))
    gamma = 1.0 + 0.1 * jax.random.normal(kg, (cout,), jnp.float32)
    beta = 0.1 * jax.random.normal(kb, (cout,), jnp.float32)
    mean = 0.1 * jax.random.normal(km, (cout,), jnp.float32)
    var = jnp.abs(1.0 + 0.1 * jax.random.normal(kv, (cout,), jnp.float32))
    eps = 1e-5
    s = gamma / jnp.sqrt(var + eps)
    b = beta - mean * s
    return {"w": w_hwio, "scale": s, "bias": b}


def init_stem_params(key, in_ch, mid_ch, out_ch):
    keys = jax.random.split(key, 5)
    return {
        "stem1": _conv_bn_params(keys[0], in_ch, mid_ch, 3),
        "stem2a": _conv_bn_params(keys[1], mid_ch, mid_ch // 2, 2),
        "stem2b": _conv_bn_params(keys[2], mid_ch // 2, mid_ch, 2),
        "stem3": _conv_bn_params(keys[3], mid_ch * 2, mid_ch, 3),
        "stem4": _conv_bn_params(keys[4], mid_ch, out_ch, 1),
    }


# ---------------------------------------------------------------------------
# StemBlock forward (NCHW in / NCHW out, like the PyTorch module)
# ---------------------------------------------------------------------------
def stem_block(x_nchw, params):
    n, cin, h, w = x_nchw.shape
    assert h % 4 == 0 and w % 4 == 0, "H and W must be multiples of 4"
    mid = params["stem1"]["w"].shape[-1]
    out_ch = params["stem4"]["w"].shape[-1]
    assert mid % 2 == 0

    h1, w1 = h // 2, w // 2            # stem1 / stem2 / pool spatial size
    h2, w2 = h1 // 2, w1 // 2          # stem3 / stem4 spatial size
    hg2, wg2 = h1 + 2, w1 + 2          # padded grid carrying intermediates
    wq = w2 + 1                        # s2d grid width for stem3 inputs

    # flat-row bookkeeping: each stage's value carries enough trailing rows
    # for its consumer's shifted-slice taps (offsets up to wg2 + 1).
    l_img = _ceil8(hg2 * wg2)              # pool / stem2b HBM outputs
    l_h2a = _ceil8(l_img + wg2 + 2)        # stem2a intermediate (VMEM only)
    l_y1 = _ceil8(l_h2a + wg2 + 2)         # stem1 intermediate (VMEM only)
    l_xf = _ceil8(l_y1 + wg2 + 2)          # s2d input rows
    l_o3 = _ceil8(h2 * wq)                 # kernel-B output rows
    l_in3 = _ceil8(max(l_o3 + wq + 2, (h2 + 1) * wq))

    # single shared validity mask on the padded grid (sliced per stage).
    r = np.arange(l_y1)
    py, px = r // wg2, r % wg2
    mvalid = (py >= 1) & (py <= h1) & (px >= 1) & (px <= w1)
    m1 = jnp.asarray(mvalid, jnp.float32).reshape(l_y1, 1)

    # ---- fold BN into bf16 weights, tap-stacked layouts ----
    p1, p2a, p2b, p3, p4 = (params[k] for k in
                            ("stem1", "stem2a", "stem2b", "stem3", "stem4"))
    w1t = _w_taps_3x3_s2(p1["w"], p1["scale"])              # (16*cin, mid)
    w2at = _w_taps_2x2(p2a["w"], p2a["scale"])              # (4*mid, mid//2)
    w2bt = _w_taps_2x2(p2b["w"], p2b["scale"])              # (4*(mid//2), mid)
    w3 = p3["w"]
    w3a = _w_taps_3x3_s2(w3[:, :, :mid, :], p3["scale"])    # pool half
    w3b = _w_taps_3x3_s2(w3[:, :, mid:, :], p3["scale"])    # stem2b half
    w4m = _w_1x1(p4["w"], p4["scale"])                      # (mid, out_ch)
    b1, b2a, b2b, b3, b4 = (_bias_row(p["bias"])
                            for p in (p1, p2a, p2b, p3, p4))

    # ---- input glue: NCHW -> NHWC (bf16), pad 1, space-to-depth, flatten ----
    xh = jnp.transpose(x_nchw, (0, 2, 3, 1)).astype(jnp.bfloat16)
    xpad = jnp.pad(xh, ((0, 0), (1, 1), (1, 1), (0, 0)))
    s = _s2d(xpad)                                      # (n, h1+1, w1+1, 4cin)
    s = jnp.pad(s, ((0, 0), (0, 0), (0, 1), (0, 0)))    # grid width -> wg2
    s = s.reshape(n, (h1 + 1) * wg2, 4 * cin)
    # wg2+1 leading zero rows so the padded-grid output row r reads its taps
    # at r + {0, 1, wg2, wg2+1} without negative offsets.
    xf = jnp.pad(s, ((0, 0),
                     (wg2 + 1, l_xf - (wg2 + 1) - (h1 + 1) * wg2),
                     (0, 0)))

    # ---- kernel A: stem1 + pool + stem2a + stem2b fused ----
    kern_a = functools.partial(_stem12_kernel, wg2=wg2, l_y1=l_y1,
                               l_h2a=l_h2a, l_img=l_img)
    xpool, y2 = pl.pallas_call(
        kern_a,
        grid=(n,),
        in_specs=[_bspec(xf), _fspec(m1), _fspec(w1t), _fspec(b1),
                  _fspec(w2at), _fspec(b2a), _fspec(w2bt), _fspec(b2b)],
        out_specs=(pl.BlockSpec((None, l_img, mid), lambda i: (i, 0, 0)),
                   pl.BlockSpec((None, l_img, mid), lambda i: (i, 0, 0))),
        out_shape=(jax.ShapeDtypeStruct((n, l_img, mid), jnp.bfloat16),
                   jax.ShapeDtypeStruct((n, l_img, mid), jnp.bfloat16)),
        compiler_params=_PARALLEL,
    )(xf, m1, w1t, b1, w2at, b2a, w2bt, b2b)

    # ---- glue: quarter-res space-to-depth of the padded-grid intermediates
    # (the zero ring already provides stem3's 'same' padding; bf16, mid lanes)
    def _s2d_flat(t):
        g = t[:, :hg2 * wg2, :].reshape(n, hg2, wg2, mid)
        sg = _s2d(g).reshape(n, (h2 + 1) * wq, 4 * mid)
        return jnp.pad(sg, ((0, 0), (0, l_in3 - (h2 + 1) * wq), (0, 0)))

    x1f = _s2d_flat(xpool)
    x2f = _s2d_flat(y2)

    # ---- kernel B: stem3 (folded concat) + stem4 fused ----
    kern_b = functools.partial(_stem34_kernel, wq=wq, l_o3=l_o3)
    y3 = pl.pallas_call(
        kern_b,
        grid=(n,),
        in_specs=[_bspec(x1f), _bspec(x2f), _fspec(w3a), _fspec(w3b),
                  _fspec(b3), _fspec(w4m), _fspec(b4)],
        out_specs=pl.BlockSpec((None, l_o3, out_ch), lambda i: (i, 0, 0)),
        out_shape=jax.ShapeDtypeStruct((n, l_o3, out_ch), jnp.float32),
        compiler_params=_PARALLEL,
    )(x1f, x2f, w3a, w3b, b3, w4m, b4)

    # ---- final glue: crop valid rows/cols, back to NCHW ----
    out = y3[:, :h2 * wq, :].reshape(n, h2, wq, out_ch)[:, :, :w2, :]
    return jnp.transpose(out, (0, 3, 1, 2))


# ---------------------------------------------------------------------------
# Pure-JAX reference (same bf16 matmul-input rounding) for a sanity check
# ---------------------------------------------------------------------------
def _ref_conv(x, w, scale, bias, stride, pad):
    xb = x.astype(jnp.bfloat16)
    wb = (w * scale[None, None, None, :]).astype(jnp.bfloat16)
    y = jax.lax.conv_general_dilated(
        xb, wb, window_strides=(stride, stride), padding=pad,
        dimension_numbers=("NHWC", "HWIO", "NHWC"),
        preferred_element_type=jnp.float32)
    return jnp.maximum(y + bias[None, None, None, :], 0.0)


def stem_block_ref(x_nchw, params):
    p = params
    x = jnp.transpose(x_nchw, (0, 2, 3, 1))
    x = _ref_conv(x, p["stem1"]["w"], p["stem1"]["scale"], p["stem1"]["bias"],
                  2, ((1, 1), (1, 1)))
    x2 = _ref_conv(x, p["stem2a"]["w"], p["stem2a"]["scale"],
                   p["stem2a"]["bias"], 1, ((0, 1), (0, 1)))
    x2 = _ref_conv(x2, p["stem2b"]["w"], p["stem2b"]["scale"],
                   p["stem2b"]["bias"], 1, ((0, 1), (0, 1)))
    xp = jnp.pad(x, ((0, 0), (0, 1), (0, 1), (0, 0)),
                 constant_values=-jnp.inf)
    x1 = jnp.maximum(jnp.maximum(xp[:, :-1, :-1, :], xp[:, :-1, 1:, :]),
                     jnp.maximum(xp[:, 1:, :-1, :], xp[:, 1:, 1:, :]))
    xc = jnp.concatenate([x1, x2], axis=-1)
    x = _ref_conv(xc, p["stem3"]["w"], p["stem3"]["scale"], p["stem3"]["bias"],
                  2, ((1, 1), (1, 1)))
    x = _ref_conv(x, p["stem4"]["w"], p["stem4"]["scale"], p["stem4"]["bias"],
                  1, ((0, 0), (0, 0)))
    return jnp.transpose(x, (0, 3, 1, 2))


if __name__ == "__main__":
    key = jax.random.PRNGKey(0)
    kx, kp = jax.random.split(key)
    in_ch, mid_ch, out_ch = 4, 16, 32
    x = jax.random.normal(kx, (2, in_ch, 16, 16), jnp.float32)
    params = init_stem_params(kp, in_ch, mid_ch, out_ch)

    out = jax.jit(stem_block)(x, params)
    jax.block_until_ready(out)
    assert out.shape == (2, out_ch, 4, 4), out.shape
    assert bool(jnp.all(jnp.isfinite(out)))

    ref = jax.jit(stem_block_ref)(x, params)
    jax.block_until_ready(ref)
    err = float(jnp.max(jnp.abs(out - ref)))
    assert bool(jnp.allclose(out, ref, atol=1e-2, rtol=1e-2)), err

    print("KERNEL_OK")
</pallas_src>

<mosaic_0001>
module attributes {stable_mosaic.version = 11 : i64} {
  func.func @_stem12_kernel(%arg0: i32, %arg1: memref<1x152x16xbf16, #tpu.memory_space<vmem>>, %arg2: memref<136x1xf32, #tpu.memory_space<vmem>>, %arg3: memref<64x16xbf16, #tpu.memory_space<vmem>>, %arg4: memref<1x16xf32, #tpu.memory_space<vmem>>, %arg5: memref<64x8xbf16, #tpu.memory_space<vmem>>, %arg6: memref<1x8xf32, #tpu.memory_space<vmem>>, %arg7: memref<32x16xbf16, #tpu.memory_space<vmem>>, %arg8: memref<1x16xf32, #tpu.memory_space<vmem>>, %arg9: memref<1x104x16xbf16, #tpu.memory_space<vmem>>, %arg10: memref<1x104x16xbf16, #tpu.memory_space<vmem>>) attributes {dimension_semantics = [#tpu.dimension_semantics<parallel>], iteration_bounds = array<i64: 2>, scalar_prefetch = 0 : i64, scratch_operands = 0 : i64, tpu.core_type = #tpu.core_type<tc>, window_params = [{transform_indices = @transform_0, window_bounds = array<i64: 1, 152, 16>}, {pipeline_mode = #tpu.pipeline_mode<synchronous>, transform_indices = @transform_1, window_bounds = array<i64: 136, 1>}, {pipeline_mode = #tpu.pipeline_mode<synchronous>, transform_indices = @transform_2, window_bounds = array<i64: 64, 16>}, {pipeline_mode = #tpu.pipeline_mode<synchronous>, transform_indices = @transform_3, window_bounds = array<i64: 1, 16>}, {pipeline_mode = #tpu.pipeline_mode<synchronous>, transform_indices = @transform_4, window_bounds = array<i64: 64, 8>}, {pipeline_mode = #tpu.pipeline_mode<synchronous>, transform_indices = @transform_5, window_bounds = array<i64: 1, 8>}, {pipeline_mode = #tpu.pipeline_mode<synchronous>, transform_indices = @transform_6, window_bounds = array<i64: 32, 16>}, {pipeline_mode = #tpu.pipeline_mode<synchronous>, transform_indices = @transform_7, window_bounds = array<i64: 1, 16>}, {transform_indices = @transform_8, window_bounds = array<i64: 1, 104, 16>}, {transform_indices = @transform_9, window_bounds = array<i64: 1, 104, 16>}]} {
    %c0 = arith.constant 0 : index
    %c0_0 = arith.constant 0 : index
    %c0_1 = arith.constant 0 : index
    %0 = vector.load %arg1[%c0, %c0_0, %c0_1] : memref<1x152x16xbf16, #tpu.memory_space<vmem>>, vector<1x152x16xbf16>
    %1 = vector.shape_cast %0 : vector<1x152x16xbf16> to vector<152x16xbf16>
    %2 = arith.extf %1 : vector<152x16xbf16> to vector<152x16xf32>
    %cst = arith.constant 0.000000e+00 : f32
    %3 = vector.broadcast %cst : f32 to vector<136x16xf32>
    %4 = vector.extract_strided_slice %2 {offsets = [0, 0], sizes = [136, 16], strides = [1, 1]} : vector<152x16xf32> to vector<136x16xf32>
    %5 = arith.truncf %4 : vector<136x16xf32> to vector<136x16xbf16>
    %c0_2 = arith.constant 0 : index
    %c0_3 = arith.constant 0 : index
    %6 = vector.load %arg3[%c0_2, %c0_3] : memref<64x16xbf16, #tpu.memory_space<vmem>>, vector<16x16xbf16>
    %cst_4 = arith.constant dense<0.000000e+00> : vector<136x16xf32>
    %7 = tpu.matmul %5, %6, %cst_4 {dimension_numbers = #tpu.dot_dimension_numbers<[1], [0], [0], [1], [0, 0, 1, 1], [], []>} : vector<136x16xbf16>, vector<16x16xbf16>, vector<136x16xf32> -> vector<136x16xf32>
    %8 = arith.addf %3, %7 : vector<136x16xf32>
    %9 = vector.extract_strided_slice %2 {offsets = [1, 0], sizes = [136, 16], strides = [1, 1]} : vector<152x16xf32> to vector<136x16xf32>
    %10 = arith.truncf %9 : vector<136x16xf32> to vector<136x16xbf16>
    %c16 = arith.constant 16 : index
    %c0_5 = arith.constant 0 : index
    %11 = vector.load %arg3[%c16, %c0_5] : memref<64x16xbf16, #tpu.memory_space<vmem>>, vector<16x16xbf16>
    %cst_6 = arith.constant dense<0.000000e+00> : vector<136x16xf32>
    %12 = tpu.matmul %10, %11, %cst_6 {dimension_numbers = #tpu.dot_dimension_numbers<[1], [0], [0], [1], [0, 0, 1, 1], [], []>} : vector<136x16xbf16>, vector<16x16xbf16>, vector<136x16xf32> -> vector<136x16xf32>
    %13 = arith.addf %8, %12 : vector<136x16xf32>
    %14 = vector.extract_strided_slice %2 {offsets = [10, 0], sizes = [136, 16], strides = [1, 1]} : vector<152x16xf32> to vector<136x16xf32>
    %15 = arith.truncf %14 : vector<136x16xf32> to vector<136x16xbf16>
    %c32 = arith.constant 32 : index
    %c0_7 = arith.constant 0 : index
    %16 = vector.load %arg3[%c32, %c0_7] : memref<64x16xbf16, #tpu.memory_space<vmem>>, vector<16x16xbf16>
    %cst_8 = arith.constant dense<0.000000e+00> : vector<136x16xf32>
    %17 = tpu.matmul %15, %16, %cst_8 {dimension_numbers = #tpu.dot_dimension_numbers<[1], [0], [0], [1], [0, 0, 1, 1], [], []>} : vector<136x16xbf16>, vector<16x16xbf16>, vector<136x16xf32> -> vector<136x16xf32>
    %18 = arith.addf %13, %17 : vector<136x16xf32>
    %19 = vector.extract_strided_slice %2 {offsets = [11, 0], sizes = [136, 16], strides = [1, 1]} : vector<152x16xf32> to vector<136x16xf32>
    %20 = arith.truncf %19 : vector<136x16xf32> to vector<136x16xbf16>
    %c48 = arith.constant 48 : index
    %c0_9 = arith.constant 0 : index
    %21 = vector.load %arg3[%c48, %c0_9] : memref<64x16xbf16, #tpu.memory_space<vmem>>, vector<16x16xbf16>
    %cst_10 = arith.constant dense<0.000000e+00> : vector<136x16xf32>
    %22 = tpu.matmul %20, %21, %cst_10 {dimension_numbers = #tpu.dot_dimension_numbers<[1], [0], [0], [1], [0, 0, 1, 1], [], []>} : vector<136x16xbf16>, vector<16x16xbf16>, vector<136x16xf32> -> vector<136x16xf32>
    %23 = arith.addf %18, %22 : vector<136x16xf32>
    %c0_11 = arith.constant 0 : index
    %c0_12 = arith.constant 0 : index
    %24 = vector.load %arg4[%c0_11, %c0_12] : memref<1x16xf32, #tpu.memory_space<vmem>>, vector<1x16xf32>
    %25 = vector.broadcast %24 : vector<1x16xf32> to vector<136x16xf32>
    %26 = arith.addf %23, %25 : vector<136x16xf32>
    %cst_13 = arith.constant 0.000000e+00 : f32
    %27 = vector.broadcast %cst_13 : f32 to vector<136x16xf32>
    %28 = arith.maximumf %26, %27 : vector<136x16xf32>
    %c0_14 = arith.constant 0 : index
    %c0_15 = arith.constant 0 : index
    %29 = vector.load %arg2[%c0_14, %c0_15] : memref<136x1xf32, #tpu.memory_space<vmem>>, vector<136x1xf32>
    %30 = vector.broadcast %29 : vector<136x1xf32> to vector<136x16xf32>
    %31 = arith.mulf %28, %30 : vector<136x16xf32>
    %32 = vector.extract_strided_slice %31 {offsets = [0, 0], sizes = [104, 16], strides = [1, 1]} : vector<136x16xf32> to vector<104x16xf32>
    %33 = vector.extract_strided_slice %31 {offsets = [1, 0], sizes = [104, 16], strides = [1, 1]} : vector<136x16xf32> to vector<104x16xf32>
    %34 = arith.maximumf %32, %33 : vector<104x16xf32>
    %35 = vector.extract_strided_slice %31 {offsets = [10, 0], sizes = [104, 16], strides = [1, 1]} : vector<136x16xf32> to vector<104x16xf32>
    %36 = arith.maximumf %34, %35 : vector<104x16xf32>
    %37 = vector.extract_strided_slice %31 {offsets = [11, 0], sizes = [104, 16], strides = [1, 1]} : vector<136x16xf32> to vector<104x16xf32>
    %38 = arith.maximumf %36, %37 : vector<104x16xf32>
    %c0_16 = arith.constant 0 : index
    %c0_17 = arith.constant 0 : index
    %39 = vector.load %arg2[%c0_16, %c0_17] : memref<136x1xf32, #tpu.memory_space<vmem>>, vector<104x1xf32>
    %40 = vector.broadcast %39 : vector<104x1xf32> to vector<104x16xf32>
    %41 = arith.mulf %38, %40 : vector<104x16xf32>
    %42 = arith.truncf %41 : vector<104x16xf32> to vector<104x16xbf16>
    %c0_18 = arith.constant 0 : index
    %c0_19 = arith.constant 0 : index
    %c0_20 = arith.constant 0 : index
    %43 = vector.load %arg9[%c0_18, %c0_19, %c0_20] : memref<1x104x16xbf16, #tpu.memory_space<vmem>>, vector<1x104x16xbf16>
    %44 = vector.shape_cast %43 : vector<1x104x16xbf16> to vector<104x16xbf16>
    %45 = vector.shape_cast %42 : vector<104x16xbf16> to vector<1x104x16xbf16>
    tpu.vector_store %arg9[%c0_18, %c0_19, %c0_20], %45 {strides = array<i32>} : memref<1x104x16xbf16, #tpu.memory_space<vmem>>, vector<1x104x16xbf16>,
    %cst_21 = arith.constant 0.000000e+00 : f32
    %46 = vector.broadcast %cst_21 : f32 to vector<120x8xf32>
    %47 = vector.extract_strided_slice %31 {offsets = [0, 0], sizes = [120, 16], strides = [1, 1]} : vector<136x16xf32> to vector<120x16xf32>
    %48 = arith.truncf %47 : vector<120x16xf32> to vector<120x16xbf16>
    %c0_22 = arith.constant 0 : index
    %c0_23 = arith.constant 0 : index
    %49 = vector.load %arg5[%c0_22, %c0_23] : memref<64x8xbf16, #tpu.memory_space<vmem>>, vector<16x8xbf16>
    %cst_24 = arith.constant dense<0.000000e+00> : vector<120x8xf32>
    %50 = tpu.matmul %48, %49, %cst_24 {dimension_numbers = #tpu.dot_dimension_numbers<[1], [0], [0], [1], [0, 0, 1, 1], [], []>} : vector<120x16xbf16>, vector<16x8xbf16>, vector<120x8xf32> -> vector<120x8xf32>
    %51 = arith.addf %46, %50 : vector<120x8xf32>
    %52 = vector.extract_strided_slice %31 {offsets = [1, 0], sizes = [120, 16], strides = [1, 1]} : vector<136x16xf32> to vector<120x16xf32>
    %53 = arith.truncf %52 : vector<120x16xf32> to vector<120x16xbf16>
    %c16_25 = arith.constant 16 : index
    %c0_26 = arith.constant 0 : index
    %54 = vector.load %arg5[%c16_25, %c0_26] : memref<64x8xbf16, #tpu.memory_space<vmem>>, vector<16x8xbf16>
    %cst_27 = arith.constant dense<0.000000e+00> : vector<120x8xf32>
    %55 = tpu.matmul %53, %54, %cst_27 {dimension_numbers = #tpu.dot_dimension_numbers<[1], [0], [0], [1], [0, 0, 1, 1], [], []>} : vector<120x16xbf16>, vector<16x8xbf16>, vector<120x8xf32> -> vector<120x8xf32>
    %56 = arith.addf %51, %55 : vector<120x8xf32>
    %57 = vector.extract_strided_slice %31 {offsets = [10, 0], sizes = [120, 16], strides = [1, 1]} : vector<136x16xf32> to vector<120x16xf32>
    %58 = arith.truncf %57 : vector<120x16xf32> to vector<120x16xbf16>
    %c32_28 = arith.constant 32 : index
    %c0_29 = arith.constant 0 : index
    %59 = vector.load %arg5[%c32_28, %c0_29] : memref<64x8xbf16, #tpu.memory_space<vmem>>, vector<16x8xbf16>
    %cst_30 = arith.constant dense<0.000000e+00> : vector<120x8xf32>
    %60 = tpu.matmul %58, %59, %cst_30 {dimension_numbers = #tpu.dot_dimension_numbers<[1], [0], [0], [1], [0, 0, 1, 1], [], []>} : vector<120x16xbf16>, vector<16x8xbf16>, vector<120x8xf32> -> vector<120x8xf32>
    %61 = arith.addf %56, %60 : vector<120x8xf32>
    %62 = vector.extract_strided_slice %31 {offsets = [11, 0], sizes = [120, 16], strides = [1, 1]} : vector<136x16xf32> to vector<120x16xf32>
    %63 = arith.truncf %62 : vector<120x16xf32> to vector<120x16xbf16>
    %c48_31 = arith.constant 48 : index
    %c0_32 = arith.constant 0 : index
    %64 = vector.load %arg5[%c48_31, %c0_32] : memref<64x8xbf16, #tpu.memory_space<vmem>>, vector<16x8xbf16>
    %cst_33 = arith.constant dense<0.000000e+00> : vector<120x8xf32>
    %65 = tpu.matmul %63, %64, %cst_33 {dimension_numbers = #tpu.dot_dimension_numbers<[1], [0], [0], [1], [0, 0, 1, 1], [], []>} : vector<120x16xbf16>, vector<16x8xbf16>, vector<120x8xf32> -> vector<120x8xf32>
    %66 = arith.addf %61, %65 : vector<120x8xf32>
    %c0_34 = arith.constant 0 : index
    %c0_35 = arith.constant 0 : index
    %67 = vector.load %arg6[%c0_34, %c0_35] : memref<1x8xf32, #tpu.memory_space<vmem>>, vector<1x8xf32>
    %68 = vector.broadcast %67 : vector<1x8xf32> to vector<120x8xf32>
    %69 = arith.addf %66, %68 : vector<120x8xf32>
    %cst_36 = arith.constant 0.000000e+00 : f32
    %70 = vector.broadcast %cst_36 : f32 to vector<120x8xf32>
    %71 = arith.maximumf %69, %70 : vector<120x8xf32>
    %c0_37 = arith.constant 0 : index
    %c0_38 = arith.constant 0 : index
    %72 = vector.load %arg2[%c0_37, %c0_38] : memref<136x1xf32, #tpu.memory_space<vmem>>, vector<120x1xf32>
    %73 = vector.broadcast %72 : vector<120x1xf32> to vector<120x8xf32>
    %74 = arith.mulf %71, %73 : vector<120x8xf32>
    %cst_39 = arith.constant 0.000000e+00 : f32
    %75 = vector.broadcast %cst_39 : f32 to vector<104x16xf32>
    %76 = vector.extract_strided_slice %74 {offsets = [0, 0], sizes = [104, 8], strides = [1, 1]} : vector<120x8xf32> to vector<104x8xf32>
    %77 = arith.truncf %76 : vector<104x8xf32> to vector<104x8xbf16>
    %c0_40 = arith.constant 0 : index
    %c0_41 = arith.constant 0 : index
    %78 = vector.load %arg7[%c0_40, %c0_41] : memref<32x16xbf16, #tpu.memory_space<vmem>>, vector<8x16xbf16>
    %cst_42 = arith.constant dense<0.000000e+00> : vector<104x16xf32>
    %79 = tpu.matmul %77, %78, %cst_42 {dimension_numbers = #tpu.dot_dimension_numbers<[1], [0], [0], [1], [0, 0, 1, 1], [], []>} : vector<104x8xbf16>, vector<8x16xbf16>, vector<104x16xf32> -> vector<104x16xf32>
    %80 = arith.addf %75, %79 : vector<104x16xf32>
    %81 = vector.extract_strided_slice %74 {offsets = [1, 0], sizes = [104, 8], strides = [1, 1]} : vector<120x8xf32> to vector<104x8xf32>
    %82 = arith.truncf %81 : vector<104x8xf32> to vector<104x8xbf16>
    %c8 = arith.constant 8 : index
    %c0_43 = arith.constant 0 : index
    %83 = vector.load %arg7[%c8, %c0_43] : memref<32x16xbf16, #tpu.memory_space<vmem>>, vector<8x16xbf16>
    %cst_44 = arith.constant dense<0.000000e+00> : vector<104x16xf32>
    %84 = tpu.matmul %82, %83, %cst_44 {dimension_numbers = #tpu.dot_dimension_numbers<[1], [0], [0], [1], [0, 0, 1, 1], [], []>} : vector<104x8xbf16>, vector<8x16xbf16>, vector<104x16xf32> -> vector<104x16xf32>
    %85 = arith.addf %80, %84 : vector<104x16xf32>
    %86 = vector.extract_strided_slice %74 {offsets = [10, 0], sizes = [104, 8], strides = [1, 1]} : vector<120x8xf32> to vector<104x8xf32>
    %87 = arith.truncf %86 : vector<104x8xf32> to vector<104x8xbf16>
    %c16_45 = arith.constant 16 : index
    %c0_46 = arith.constant 0 : index
    %88 = vector.load %arg7[%c16_45, %c0_46] : memref<32x16xbf16, #tpu.memory_space<vmem>>, vector<8x16xbf16>
    %cst_47 = arith.constant dense<0.000000e+00> : vector<104x16xf32>
    %89 = tpu.matmul %87, %88, %cst_47 {dimension_numbers = #tpu.dot_dimension_numbers<[1], [0], [0], [1], [0, 0, 1, 1], [], []>} : vector<104x8xbf16>, vector<8x16xbf16>, vector<104x16xf32> -> vector<104x16xf32>
    %90 = arith.addf %85, %89 : vector<104x16xf32>
    %91 = vector.extract_strided_slice %74 {offsets = [11, 0], sizes = [104, 8], strides = [1, 1]} : vector<120x8xf32> to vector<104x8xf32>
    %92 = arith.truncf %91 : vector<104x8xf32> to vector<104x8xbf16>
    %c24 = arith.constant 24 : index
    %c0_48 = arith.constant 0 : index
    %93 = vector.load %arg7[%c24, %c0_48] : memref<32x16xbf16, #tpu.memory_space<vmem>>, vector<8x16xbf16>
    %cst_49 = arith.constant dense<0.000000e+00> : vector<104x16xf32>
    %94 = tpu.matmul %92, %93, %cst_49 {dimension_numbers = #tpu.dot_dimension_numbers<[1], [0], [0], [1], [0, 0, 1, 1], [], []>} : vector<104x8xbf16>, vector<8x16xbf16>, vector<104x16xf32> -> vector<104x16xf32>
    %95 = arith.addf %90, %94 : vector<104x16xf32>
    %c0_50 = arith.constant 0 : index
    %c0_51 = arith.constant 0 : index
    %96 = vector.load %arg8[%c0_50, %c0_51] : memref<1x16xf32, #tpu.memory_space<vmem>>, vector<1x16xf32>
    %97 = vector.broadcast %96 : vector<1x16xf32> to vector<104x16xf32>
    %98 = arith.addf %95, %97 : vector<104x16xf32>
    %cst_52 = arith.constant 0.000000e+00 : f32
    %99 = vector.broadcast %cst_52 : f32 to vector<104x16xf32>
    %100 = arith.maximumf %98, %99 : vector<104x16xf32>
    %c0_53 = arith.constant 0 : index
    %c0_54 = arith.constant 0 : index
    %101 = vector.load %arg2[%c0_53, %c0_54] : memref<136x1xf32, #tpu.memory_space<vmem>>, vector<104x1xf32>
    %102 = vector.broadcast %101 : vector<104x1xf32> to vector<104x16xf32>
    %103 = arith.mulf %100, %102 : vector<104x16xf32>
    %104 = arith.truncf %103 : vector<104x16xf32> to vector<104x16xbf16>
    %c0_55 = arith.constant 0 : index
    %c0_56 = arith.constant 0 : index
    %c0_57 = arith.constant 0 : index
    %105 = vector.load %arg10[%c0_55, %c0_56, %c0_57] : memref<1x104x16xbf16, #tpu.memory_space<vmem>>, vector<1x104x16xbf16>
    %106 = vector.shape_cast %105 : vector<1x104x16xbf16> to vector<104x16xbf16>
    %107 = vector.shape_cast %104 : vector<104x16xbf16> to vector<1x104x16xbf16>
    tpu.vector_store %arg10[%c0_55, %c0_56, %c0_57], %107 {strides = array<i32>} : memref<1x104x16xbf16, #tpu.memory_space<vmem>>, vector<1x104x16xbf16>,
    return
  }
  func.func @transform_0(%arg0: i32) -> (i32, i32, i32) {
    %c0_i32 = arith.constant 0 : i32
    %c0_i32_0 = arith.constant 0 : i32
    %c0_i32_1 = arith.constant 0 : i32
    return %arg0, %c0_i32, %c0_i32_0 : i32, i32, i32
  }
  func.func @transform_1(%arg0: i32) -> (i32, i32) {
    %c0_i32 = arith.constant 0 : i32
    %c0_i32_0 = arith.constant 0 : i32
    %c0_i32_1 = arith.constant 0 : i32
    return %c0_i32, %c0_i32_0 : i32, i32
  }
  func.func @transform_2(%arg0: i32) -> (i32, i32) {
    %c0_i32 = arith.constant 0 : i32
    %c0_i32_0 = arith.constant 0 : i32
    %c0_i32_1 = arith.constant 0 : i32
    return %c0_i32, %c0_i32_0 : i32, i32
  }
  func.func @transform_3(%arg0: i32) -> (i32, i32) {
    %c0_i32 = arith.constant 0 : i32
    %c0_i32_0 = arith.constant 0 : i32
    %c0_i32_1 = arith.constant 0 : i32
    return %c0_i32, %c0_i32_0 : i32, i32
  }
  func.func @transform_4(%arg0: i32) -> (i32, i32) {
    %c0_i32 = arith.constant 0 : i32
    %c0_i32_0 = arith.constant 0 : i32
    %c0_i32_1 = arith.constant 0 : i32
    return %c0_i32, %c0_i32_0 : i32, i32
  }
  func.func @transform_5(%arg0: i32) -> (i32, i32) {
    %c0_i32 = arith.constant 0 : i32
    %c0_i32_0 = arith.constant 0 : i32
    %c0_i32_1 = arith.constant 0 : i32
    return %c0_i32, %c0_i32_0 : i32, i32
  }
  func.func @transform_6(%arg0: i32) -> (i32, i32) {
    %c0_i32 = arith.constant 0 : i32
    %c0_i32_0 = arith.constant 0 : i32
    %c0_i32_1 = arith.constant 0 : i32
    return %c0_i32, %c0_i32_0 : i32, i32
  }
  func.func @transform_7(%arg0: i32) -> (i32, i32) {
    %c0_i32 = arith.constant 0 : i32
    %c0_i32_0 = arith.constant 0 : i32
    %c0_i32_1 = arith.constant 0 : i32
    return %c0_i32, %c0_i32_0 : i32, i32
  }
  func.func @transform_8(%arg0: i32) -> (i32, i32, i32) {
    %c0_i32 = arith.constant 0 : i32
    %c0_i32_0 = arith.constant 0 : i32
    %c0_i32_1 = arith.constant 0 : i32
    return %arg0, %c0_i32, %c0_i32_0 : i32, i32, i32
  }
  func.func @transform_9(%arg0: i32) -> (i32, i32, i32) {
    %c0_i32 = arith.constant 0 : i32
    %c0_i32_0 = arith.constant 0 : i32
    %c0_i32_1 = arith.constant 0 : i32
    return %arg0, %c0_i32, %c0_i32_0 : i32, i32, i32
  }
}

module attributes {stable_mosaic.version = 11 : i64} {
  func.func @_stem34_kernel(%arg0: i32, %arg1: memref<1x32x64xbf16, #tpu.memory_space<vmem>>, %arg2: memref<1x32x64xbf16, #tpu.memory_space<vmem>>, %arg3: memref<256x16xbf16, #tpu.memory_space<vmem>>, %arg4: memref<256x16xbf16, #tpu.memory_space<vmem>>, %arg5: memref<1x16xf32, #tpu.memory_space<vmem>>, %arg6: memref<16x32xbf16, #tpu.memory_space<vmem>>, %arg7: memref<1x32xf32, #tpu.memory_space<vmem>>, %arg8: memref<1x24x32xf32, #tpu.memory_space<vmem>>) attributes {dimension_semantics = [#tpu.dimension_semantics<parallel>], iteration_bounds = array<i64: 2>, scalar_prefetch = 0 : i64, scratch_operands = 0 : i64, tpu.core_type = #tpu.core_type<tc>, window_params = [{transform_indices = @transform_0, window_bounds = array<i64: 1, 32, 64>}, {transform_indices = @transform_1, window_bounds = array<i64: 1, 32, 64>}, {pipeline_mode = #tpu.pipeline_mode<synchronous>, transform_indices = @transform_2, window_bounds = array<i64: 256, 16>}, {pipeline_mode = #tpu.pipeline_mode<synchronous>, transform_indices = @transform_3, window_bounds = array<i64: 256, 16>}, {pipeline_mode = #tpu.pipeline_mode<synchronous>, transform_indices = @transform_4, window_bounds = array<i64: 1, 16>}, {pipeline_mode = #tpu.pipeline_mode<synchronous>, transform_indices = @transform_5, window_bounds = array<i64: 16, 32>}, {pipeline_mode = #tpu.pipeline_mode<synchronous>, transform_indices = @transform_6, window_bounds = array<i64: 1, 32>}, {transform_indices = @transform_7, window_bounds = array<i64: 1, 24, 32>}]} {
    %c0 = arith.constant 0 : index
    %c0_0 = arith.constant 0 : index
    %c0_1 = arith.constant 0 : index
    %0 = vector.load %arg1[%c0, %c0_0, %c0_1] : memref<1x32x64xbf16, #tpu.memory_space<vmem>>, vector<1x32x64xbf16>
    %1 = vector.shape_cast %0 : vector<1x32x64xbf16> to vector<32x64xbf16>
    %2 = arith.extf %1 : vector<32x64xbf16> to vector<32x64xf32>
    %c0_2 = arith.constant 0 : index
    %c0_3 = arith.constant 0 : index
    %c0_4 = arith.constant 0 : index
    %3 = vector.load %arg2[%c0_2, %c0_3, %c0_4] : memref<1x32x64xbf16, #tpu.memory_space<vmem>>, vector<1x32x64xbf16>
    %4 = vector.shape_cast %3 : vector<1x32x64xbf16> to vector<32x64xbf16>
    %5 = arith.extf %4 : vector<32x64xbf16> to vector<32x64xf32>
    %cst = arith.constant 0.000000e+00 : f32
    %6 = vector.broadcast %cst : f32 to vector<24x16xf32>
    %7 = vector.extract_strided_slice %2 {offsets = [0, 0], sizes = [24, 64], strides = [1, 1]} : vector<32x64xf32> to vector<24x64xf32>
    %8 = arith.truncf %7 : vector<24x64xf32> to vector<24x64xbf16>
    %c0_5 = arith.constant 0 : index
    %c0_6 = arith.constant 0 : index
    %9 = vector.load %arg3[%c0_5, %c0_6] : memref<256x16xbf16, #tpu.memory_space<vmem>>, vector<64x16xbf16>
    %cst_7 = arith.constant dense<0.000000e+00> : vector<24x16xf32>
    %10 = tpu.matmul %8, %9, %cst_7 {dimension_numbers = #tpu.dot_dimension_numbers<[1], [0], [0], [1], [0, 0, 1, 1], [], []>} : vector<24x64xbf16>, vector<64x16xbf16>, vector<24x16xf32> -> vector<24x16xf32>
    %11 = arith.addf %6, %10 : vector<24x16xf32>
    %12 = vector.extract_strided_slice %5 {offsets = [0, 0], sizes = [24, 64], strides = [1, 1]} : vector<32x64xf32> to vector<24x64xf32>
    %13 = arith.truncf %12 : vector<24x64xf32> to vector<24x64xbf16>
    %c0_8 = arith.constant 0 : index
    %c0_9 = arith.constant 0 : index
    %14 = vector.load %arg4[%c0_8, %c0_9] : memref<256x16xbf16, #tpu.memory_space<vmem>>, vector<64x16xbf16>
    %cst_10 = arith.constant dense<0.000000e+00> : vector<24x16xf32>
    %15 = tpu.matmul %13, %14, %cst_10 {dimension_numbers = #tpu.dot_dimension_numbers<[1], [0], [0], [1], [0, 0, 1, 1], [], []>} : vector<24x64xbf16>, vector<64x16xbf16>, vector<24x16xf32> -> vector<24x16xf32>
    %16 = arith.addf %11, %15 : vector<24x16xf32>
    %17 = vector.extract_strided_slice %2 {offsets = [1, 0], sizes = [24, 64], strides = [1, 1]} : vector<32x64xf32> to vector<24x64xf32>
    %18 = arith.truncf %17 : vector<24x64xf32> to vector<24x64xbf16>
    %c64 = arith.constant 64 : index
    %c0_11 = arith.constant 0 : index
    %19 = vector.load %arg3[%c64, %c0_11] : memref<256x16xbf16, #tpu.memory_space<vmem>>, vector<64x16xbf16>
    %cst_12 = arith.constant dense<0.000000e+00> : vector<24x16xf32>
    %20 = tpu.matmul %18, %19, %cst_12 {dimension_numbers = #tpu.dot_dimension_numbers<[1], [0], [0], [1], [0, 0, 1, 1], [], []>} : vector<24x64xbf16>, vector<64x16xbf16>, vector<24x16xf32> -> vector<24x16xf32>
    %21 = arith.addf %16, %20 : vector<24x16xf32>
    %22 = vector.extract_strided_slice %5 {offsets = [1, 0], sizes = [24, 64], strides = [1, 1]} : vector<32x64xf32> to vector<24x64xf32>
    %23 = arith.truncf %22 : vector<24x64xf32> to vector<24x64xbf16>
    %c64_13 = arith.constant 64 : index
    %c0_14 = arith.constant 0 : index
    %24 = vector.load %arg4[%c64_13, %c0_14] : memref<256x16xbf16, #tpu.memory_space<vmem>>, vector<64x16xbf16>
    %cst_15 = arith.constant dense<0.000000e+00> : vector<24x16xf32>
    %25 = tpu.matmul %23, %24, %cst_15 {dimension_numbers = #tpu.dot_dimension_numbers<[1], [0], [0], [1], [0, 0, 1, 1], [], []>} : vector<24x64xbf16>, vector<64x16xbf16>, vector<24x16xf32> -> vector<24x16xf32>
    %26 = arith.addf %21, %25 : vector<24x16xf32>
    %27 = vector.extract_strided_slice %2 {offsets = [5, 0], sizes = [24, 64], strides = [1, 1]} : vector<32x64xf32> to vector<24x64xf32>
    %28 = arith.truncf %27 : vector<24x64xf32> to vector<24x64xbf16>
    %c128 = arith.constant 128 : index
    %c0_16 = arith.constant 0 : index
    %29 = vector.load %arg3[%c128, %c0_16] : memref<256x16xbf16, #tpu.memory_space<vmem>>, vector<64x16xbf16>
    %cst_17 = arith.constant dense<0.000000e+00> : vector<24x16xf32>
    %30 = tpu.matmul %28, %29, %cst_17 {dimension_numbers = #tpu.dot_dimension_numbers<[1], [0], [0], [1], [0, 0, 1, 1], [], []>} : vector<24x64xbf16>, vector<64x16xbf16>, vector<24x16xf32> -> vector<24x16xf32>
    %31 = arith.addf %26, %30 : vector<24x16xf32>
    %32 = vector.extract_strided_slice %5 {offsets = [5, 0], sizes = [24, 64], strides = [1, 1]} : vector<32x64xf32> to vector<24x64xf32>
    %33 = arith.truncf %32 : vector<24x64xf32> to vector<24x64xbf16>
    %c128_18 = arith.constant 128 : index
    %c0_19 = arith.constant 0 : index
    %34 = vector.load %arg4[%c128_18, %c0_19] : memref<256x16xbf16, #tpu.memory_space<vmem>>, vector<64x16xbf16>
    %cst_20 = arith.constant dense<0.000000e+00> : vector<24x16xf32>
    %35 = tpu.matmul %33, %34, %cst_20 {dimension_numbers = #tpu.dot_dimension_numbers<[1], [0], [0], [1], [0, 0, 1, 1], [], []>} : vector<24x64xbf16>, vector<64x16xbf16>, vector<24x16xf32> -> vector<24x16xf32>
    %36 = arith.addf %31, %35 : vector<24x16xf32>
    %37 = vector.extract_strided_slice %2 {offsets = [6, 0], sizes = [24, 64], strides = [1, 1]} : vector<32x64xf32> to vector<24x64xf32>
    %38 = arith.truncf %37 : vector<24x64xf32> to vector<24x64xbf16>
    %c192 = arith.constant 192 : index
    %c0_21 = arith.constant 0 : index
    %39 = vector.load %arg3[%c192, %c0_21] : memref<256x16xbf16, #tpu.memory_space<vmem>>, vector<64x16xbf16>
    %cst_22 = arith.constant dense<0.000000e+00> : vector<24x16xf32>
    %40 = tpu.matmul %38, %39, %cst_22 {dimension_numbers = #tpu.dot_dimension_numbers<[1], [0], [0], [1], [0, 0, 1, 1], [], []>} : vector<24x64xbf16>, vector<64x16xbf16>, vector<24x16xf32> -> vector<24x16xf32>
    %41 = arith.addf %36, %40 : vector<24x16xf32>
    %42 = vector.extract_strided_slice %5 {offsets = [6, 0], sizes = [24, 64], strides = [1, 1]} : vector<32x64xf32> to vector<24x64xf32>
    %43 = arith.truncf %42 : vector<24x64xf32> to vector<24x64xbf16>
    %c192_23 = arith.constant 192 : index
    %c0_24 = arith.constant 0 : index
    %44 = vector.load %arg4[%c192_23, %c0_24] : memref<256x16xbf16, #tpu.memory_space<vmem>>, vector<64x16xbf16>
    %cst_25 = arith.constant dense<0.000000e+00> : vector<24x16xf32>
    %45 = tpu.matmul %43, %44, %cst_25 {dimension_numbers = #tpu.dot_dimension_numbers<[1], [0], [0], [1], [0, 0, 1, 1], [], []>} : vector<24x64xbf16>, vector<64x16xbf16>, vector<24x16xf32> -> vector<24x16xf32>
    %46 = arith.addf %41, %45 : vector<24x16xf32>
    %c0_26 = arith.constant 0 : index
    %c0_27 = arith.constant 0 : index
    %47 = vector.load %arg5[%c0_26, %c0_27] : memref<1x16xf32, #tpu.memory_space<vmem>>, vector<1x16xf32>
    %48 = vector.broadcast %47 : vector<1x16xf32> to vector<24x16xf32>
    %49 = arith.addf %46, %48 : vector<24x16xf32>
    %cst_28 = arith.constant 0.000000e+00 : f32
    %50 = vector.broadcast %cst_28 : f32 to vector<24x16xf32>
    %51 = arith.maximumf %49, %50 : vector<24x16xf32>
    %52 = arith.truncf %51 : vector<24x16xf32> to vector<24x16xbf16>
    %c0_29 = arith.constant 0 : index
    %c0_30 = arith.constant 0 : index
    %53 = vector.load %arg6[%c0_29, %c0_30] : memref<16x32xbf16, #tpu.memory_space<vmem>>, vector<16x32xbf16>
    %cst_31 = arith.constant dense<0.000000e+00> : vector<24x32xf32>
    %54 = tpu.matmul %52, %53, %cst_31 {dimension_numbers = #tpu.dot_dimension_numbers<[1], [0], [0], [1], [0, 0, 1, 1], [], []>} : vector<24x16xbf16>, vector<16x32xbf16>, vector<24x32xf32> -> vector<24x32xf32>
    %c0_32 = arith.constant 0 : index
    %c0_33 = arith.constant 0 : index
    %55 = vector.load %arg7[%c0_32, %c0_33] : memref<1x32xf32, #tpu.memory_space<vmem>>, vector<1x32xf32>
    %56 = vector.broadcast %55 : vector<1x32xf32> to vector<24x32xf32>
    %57 = arith.addf %54, %56 : vector<24x32xf32>
    %cst_34 = arith.constant 0.000000e+00 : f32
    %58 = vector.broadcast %cst_34 : f32 to vector<24x32xf32>
    %59 = arith.maximumf %57, %58 : vector<24x32xf32>
    %c0_35 = arith.constant 0 : index
    %c0_36 = arith.constant 0 : index
    %c0_37 = arith.constant 0 : index
    %60 = vector.load %arg8[%c0_35, %c0_36, %c0_37] : memref<1x24x32xf32, #tpu.memory_space<vmem>>, vector<1x24x32xf32>
    %61 = vector.shape_cast %60 : vector<1x24x32xf32> to vector<24x32xf32>
    %62 = vector.shape_cast %59 : vector<24x32xf32> to vector<1x24x32xf32>
    tpu.vector_store %arg8[%c0_35, %c0_36, %c0_37], %62 {strides = array<i32>} : memref<1x24x32xf32, #tpu.memory_space<vmem>>, vector<1x24x32xf32>,
    return
  }
  func.func @transform_0(%arg0: i32) -> (i32, i32, i32) {
    %c0_i32 = arith.constant 0 : i32
    %c0_i32_0 = arith.constant 0 : i32
    %c0_i32_1 = arith.constant 0 : i32
    return %arg0, %c0_i32, %c0_i32_0 : i32, i32, i32
  }
  func.func @transform_1(%arg0: i32) -> (i32, i32, i32) {
    %c0_i32 = arith.constant 0 : i32
    %c0_i32_0 = arith.constant 0 : i32
    %c0_i32_1 = arith.constant 0 : i32
    return %arg0, %c0_i32, %c0_i32_0 : i32, i32, i32
  }
  func.func @transform_2(%arg0: i32) -> (i32, i32) {
    %c0_i32 = arith.constant 0 : i32
    %c0_i32_0 = arith.constant 0 : i32
    %c0_i32_1 = arith.constant 0 : i32
    return %c0_i32, %c0_i32_0 : i32, i32
  }
  func.func @transform_3(%arg0: i32) -> (i32, i32) {
    %c0_i32 = arith.constant 0 : i32
    %c0_i32_0 = arith.constant 0 : i32
    %c0_i32_1 = arith.constant 0 : i32
    return %c0_i32, %c0_i32_0 : i32, i32
  }
  func.func @transform_4(%arg0: i32) -> (i32, i32) {
    %c0_i32 = arith.constant 0 : i32
    %c0_i32_0 = arith.constant 0 : i32
    %c0_i32_1 = arith.constant 0 : i32
    return %c0_i32, %c0_i32_0 : i32, i32
  }
  func.func @transform_5(%arg0: i32) -> (i32, i32) {
    %c0_i32 = arith.constant 0 : i32
    %c0_i32_0 = arith.constant 0 : i32
    %c0_i32_1 = arith.constant 0 : i32
    return %c0_i32, %c0_i32_0 : i32, i32
  }
  func.func @transform_6(%arg0: i32) -> (i32, i32) {
    %c0_i32 = arith.constant 0 : i32
    %c0_i32_0 = arith.constant 0 : i32
    %c0_i32_1 = arith.constant 0 : i32
    return %c0_i32, %c0_i32_0 : i32, i32
  }
  func.func @transform_7(%arg0: i32) -> (i32, i32, i32) {
    %c0_i32 = arith.constant 0 : i32
    %c0_i32_0 = arith.constant 0 : i32
    %c0_i32_1 = arith.constant 0 : i32
    return %arg0, %c0_i32, %c0_i32_0 : i32, i32, i32
  }
}

</mosaic_0001>

<bundles_post_ra>
// kernel: stem_block.3
= control target key start
LH: loop header
LB: loop body
LE: loop exit
PB: predicated region body
PF: predicated region fallthrough
CT: control target
= control target key end

     0   :  { %s1247_s24 = smov 0   ;;  %s1432_s0 = inlined_call_operand.vmem [shape: bf16[2,32,64], index: 0, kind: input, shape index: {}]   ;;  %s1433_s1 = inlined_call_operand.vmem [shape: bf16[2,32,64], index: 1, kind: input, shape index: {}]   ;;  %s1434_s2 = inlined_call_operand.vmem [shape: bf16[256,16], index: 2, kind: input, shape index: {}]   ;;  %s1435_s3 = inlined_call_operand.vmem [shape: bf16[256,16], index: 3, kind: input, shape index: {}]   ;;  %s1436_s4 = inlined_call_operand.vmem [shape: f32[1,16], index: 4, kind: input, shape index: {}]   ;;  %s1437_s5 = inlined_call_operand.vmem [shape: bf16[16,32], index: 5, kind: input, shape index: {}]   ;;  %s1438_s6 = inlined_call_operand.vmem [shape: f32[1,32], index: 6, kind: input, shape index: {}]   ;;  %s1439_s7 = inlined_call_operand.vmem [shape: f32[2,24,32], index: 7, kind: output, shape index: {}]  }
   0x1 LB: > { %s967_s25 = sadd.s32 4294967295, %s1205_s24   ;;  %p971_p0 = scmp.ge.s32.totalorder %s1205_s24, 1  ;;  %s1205_s24 = sphi %s1247_s24, %s17_s24  }
   0x2   : > { %p247_p1 = scmp.lt.s32.totalorder %s1205_s24, 3 }
   0x4   : > { %p248_p2 = pnand %p971_p0, %p247_p1 }
   0x5   : > { %p284_p3 = scmp.lt.s32.totalorder (!%p248_p2), %s967_s25, 1 }
   0x6   : > { %251 = sbr.rel (%p248_p2) target bundleno = 371 (0x173), region = 48 }
   0xb   : > { %v1148_v0 = vld [vmem:[%s1435_s3 + $0x18] sm:$0xff]  ;;  %v1147_v3 = vld [vmem:[%s1435_s3 + $0x10] sm:$0xff]  ;;  %s1441_s25 = smov (!%p284_p3, %s967_s25), 1  ;;  %v1146_v6 = vld [vmem:[%s1435_s3 + $0x8] sm:$0xff]  ;;  %vm442_vm0 = vsmask.f32 7424 }
   0xc   : > { %v1152_v1 = vld [vmem:[%s1434_s2 + $0x38] sm:$0xff]  ;;  %1184 = vmatpush.bf16.msra.mxu1 %v1148_v0  ;;  %v1151_v4 = vld [vmem:[%s1434_s2 + $0x30] sm:$0xff]  ;;  %371 = vmatpush.bf16.msra.mxu0 %v1148_v0  ;;  %s1137_s15 = sshll.u32 %s1441_s25, 4  ;;  %v1150_v7 = vld [vmem:[%s1434_s2 + $0x28] sm:$0xff]  ;;  %vm360_vm1 = vcmask 523264   ;;  %vm725_vm3 = vcmask 1044480  }
   0xd   : > { %v1156_v2 = vld [vmem:[%s1435_s3 + $0x38] sm:$0xff]  ;;  %491 = vmatpush.bf16.msra.mxu2 %v1152_v1  ;;  %v1155_v5 = vld [vmem:[%s1435_s3 + $0x30] sm:$0xff]  ;;  %s288_s22 = scalar_lea.vmem %s1432_s0, %s1137_s15  ;;  %s293_s27 = scalar_lea.vmem %s1433_s1, %s1137_s15  ;;  %v1154_v11 = vld [vmem:[%s1435_s3 + $0x28] sm:$0xff]  ;;  %vm590_vm2 = vsmask.f32 5376  ;;  %vm868_vm4 = vcmask 130048  }
   0xe   : > { %565 = vmatpush.bf16.msra.mxu3 %v1156_v2  ;;  %v1288_v8 = vld [vmem:[%s288_s22] sm:$0xff]  ;;  %v1290_v9 = vld [vmem:[%s293_s27 + $0x8] sm:$0xff]   ;;  %v1144_v24 = vld [vmem:[%s1434_s2 + $0x18] sm:$0xff]  ;;  %s1188_s17 = smul.u32 24, %s1441_s25  ;;  %vm896_vm5 = vcmask 261120  }
   0xf   : > { %v1292_v10 = vld [vmem:[%s288_s22 + $0x8] sm:$0xff]   ;;  %v1298_v13 = vld [vmem:[%s293_s27] sm:$0xff]  ;;  %v443_v14 = vshrl.u32 %v1288_v8, 16  ;;  %v445_v15 = vshll.u32 %v1288_v8, 16  ;;  %v524_v16 = vshll.u32 %v1290_v9, 16  ;;  %v1180_v17 = vunpack.c.l.bf16 %v1290_v9  ;;  %v1160_v29 = vld [vmem:[%s1434_s2 + $0x58] sm:$0xff] }
  0x10   : > { %1185 = vmatpush.bf16.msra.mxu1 %v1147_v3  ;;  %372 = vmatpush.bf16.msra.mxu0 %v1147_v3  ;;  %v450_v12 = vshll.u32 %v1292_v10, 16  ;;  %v517_v18 = vshrl.u32 %v1298_v13, 16  ;;  %v519_v19 = vshll.u32 %v1298_v13, 16  ;;  %v1145_v20 = vld [vmem:[%s1435_s3] sm:$0xff]  ;;  %v1168_v33 = vld [vmem:[%s1434_s2 + $0x78] sm:$0xff]  ;;  %v1143_v34 = vld [vmem:[%s1434_s2 + $0x10] sm:$0xff]  ;;  %v1176_v63 = vunpack.c.l.bf16 %v1292_v10  ;;  %s298_s20 = scalar_lea.vmem %s1439_s7, %s1188_s17 }
  0x11   : > { %492 = vmatpush.bf16.msra.mxu2 %v1151_v4  ;;  %v1149_v21 = vld [vmem:[%s1434_s2 + $0x20] sm:$0xff]  ;;  %v447_v22 = vrot.slane %v445_v15, 1  ;;  %v526_v28 = vrot.slane %v524_v16, 1  ;;  %v327_v30 = vpack.c.bf16 %v1180_v17, %v1180_v17  ;;  %v1159_v36 = vld [vmem:[%s1434_s2 + $0x50] sm:$0xff]  ;;  %v1172_v37 = vld [vmem:[%s1435_s3 + $0x78] sm:$0xff]  ;;  %v454_v40 = vshrl.u32 %v1292_v10, 16 }
  0x12   : > { %566 = vmatpush.bf16.msra.mxu3 %v1155_v5  ;;  %v452_v23 = vrot.slane %v450_v12, 1  ;;  %v521_v25 = vrot.slane %v519_v19, 1  ;;  %v1153_v26 = vld [vmem:[%s1435_s3 + $0x20] sm:$0xff]  ;;  %v1167_v38 = vld [vmem:[%s1434_s2 + $0x70] sm:$0xff]  ;;  %v1142_v39 = vld [vmem:[%s1434_s2 + $0x8] sm:$0xff]  ;;  %v591_v46 = vrot.slane %v443_v14, 2  ;;  %v317_v4 = vpack.c.bf16 %v1176_v63, %v1176_v63 }
  0x13   : > { %v448_v27 = vor.u32 %v447_v22, %v443_v14  ;;  %v1158_v41 = vld [vmem:[%s1434_s2 + $0x48] sm:$0xff]  ;;  %v1171_v42 = vld [vmem:[%s1435_s3 + $0x70] sm:$0xff]  ;;  %v1141_v44 = vld [vmem:[%s1434_s2] sm:$0xff]  ;;  %v594_v45 = vrot.slane %v454_v40, 2  ;;  %v592_v47 = vrot.slane %v445_v15, 3  ;;  %v595_v48 = vrot.slane %v450_v12, 3 }
  0x14   : > { %1186 = vmatpush.bf16.msra.mxu1 %v1146_v6  ;;  %373 = vmatpush.bf16.msra.mxu0 %v1146_v6  ;;  %v522_v31 = vor.u32 %v521_v25, %v517_v18  ;;  %v1166_v43 = vld [vmem:[%s1434_s2 + $0x68] sm:$0xff]  ;;  %v1164_v49 = vld [vmem:[%s1435_s3 + $0x58] sm:$0xff]  ;;  %v1157_v50 = vld [vmem:[%s1434_s2 + $0x40] sm:$0xff]  ;;  %v528_v53 = vshrl.u32 %v1290_v9, 16  ;;  %v456_v57 = vor.u32 %v454_v40, %v452_v23  ;;  %v726_v0 = vrot.slane %v1288_v8, 3 }
  0x15   : > { %493 = vmatpush.bf16.msra.mxu2 %v1150_v7  ;;  %v453_v32 = vsel %vm442_vm0, %v448_v27, %v452_v23  ;;  %v1170_v51 = vld [vmem:[%s1435_s3 + $0x68] sm:$0xff]  ;;  %v1165_v52 = vld [vmem:[%s1434_s2 + $0x60] sm:$0xff]  ;;  %v593_v54 = vor.u32 %v592_v47, %v591_v46  ;;  %v596_v55 = vor.u32 %v595_v48, %v594_v45  ;;  %v1163_v56 = vld [vmem:[%s1435_s3 + $0x50] sm:$0xff]  ;;  %v727_v1 = vrot.slane %v1292_v10, 3 }
  0x16   : > { %567 = vmatpush.bf16.msra.mxu3 %v1154_v11  ;;  %v527_v35 = vsel %vm442_vm0, %v522_v31, %v526_v28  ;;  %v1169_v58 = vld [vmem:[%s1435_s3 + $0x60] sm:$0xff]  ;;  %v530_v59 = vor.u32 %v528_v53, %v526_v28  ;;  %v1162_v61 = vld [vmem:[%s1435_s3 + $0x48] sm:$0xff]  ;;  %v790_v2 = vrot.slane %v1298_v13, 3  ;;  %v791_v3 = vrot.slane %v1290_v9, 3 }
  0x17   : > { %v597_v60 = vsel %vm590_vm2, %v593_v54, %v596_v55  ;;  %v1161_v62 = vld [vmem:[%s1435_s3 + $0x40] sm:$0xff]  ;;  %v728_v5 = vsel %vm725_vm3, %v726_v0, %v727_v1  ;;  %v657_v7 = vrot.slane %v517_v18, 2  ;;  %v660_v10 = vrot.slane %v528_v53, 2 }
  0x18   : > { %1187 = vmatpush.bf16.msra.mxu1 %v1145_v20  ;;  %374 = vmatpush.bf16.msra.mxu0 %v1145_v20  ;;  %v792_v6 = vsel %vm725_vm3, %v790_v2, %v791_v3  ;;  %v658_v11 = vrot.slane %v519_v19, 3  ;;  %v1173_v9 = vld [vmem:[%s1437_s5] sm:$0xff] }
  0x19   : > { %494 = vmatpush.bf16.msra.mxu2 %v1149_v21 }
  0x1a   : > { %568 = vmatpush.bf16.msra.mxu3 %v1153_v26  ;;  %v659_v14 = vor.u32 %v658_v11, %v657_v7 }
  0x1b   : > { %1002 = vmatmul.msk.bf16.vlgmr.msra.gmra.mxu1 %vm360_vm1, %v327_v30  ;;  %1001 = vmatmul.msk.bf16.vlgmr.msra.gmra.mxu0 %vm360_vm1, %v1298_v13 }
  0x1c   : > { %419 = vmatpush.bf16.msrb.mxu1 %v1144_v24  ;;  %632 = vmatpush.bf16.msrb.mxu0 %v1160_v29 }
  0x1d   : > { %1037 = vmatmul.msk.bf16.vlgmr.msra.gmra.mxu2 %vm360_vm1, %v453_v32  ;;  %1055 = vmatmul.msk.bf16.vlgmr.msra.gmra.mxu3 %vm360_vm1, %v527_v35 }
  0x1e   : > { %763 = vmatpush.bf16.msrb.mxu2 %v1168_v33  ;;  %827 = vmatpush.bf16.msrb.mxu3 %v1172_v37 }
  0x20   : > { %420 = vmatpush.bf16.msrb.mxu1 %v1143_v34  ;;  %633 = vmatpush.bf16.msrb.mxu0 %v1159_v36 }
  0x22   : > { %764 = vmatpush.bf16.msrb.mxu2 %v1167_v38  ;;  %828 = vmatpush.bf16.msrb.mxu3 %v1171_v42 }
  0x24   : > { %421 = vmatpush.bf16.msrb.mxu1 %v1142_v39  ;;  %634 = vmatpush.bf16.msrb.mxu0 %v1158_v41 }
  0x26   : > { %765 = vmatpush.bf16.msrb.mxu2 %v1166_v43  ;;  %829 = vmatpush.bf16.msrb.mxu3 %v1170_v51 }
  0x28   : > { %422 = vmatpush.bf16.msrb.mxu1 %v1141_v44  ;;  %635 = vmatpush.bf16.msrb.mxu0 %v1157_v50 }
  0x2a   : > { %766 = vmatpush.bf16.msrb.mxu2 %v1165_v52  ;;  %830 = vmatpush.bf16.msrb.mxu3 %v1169_v58 }
  0x2b   : > { %1019 = vmatmul.msk.bf16.vlgmr.msrb.gmra.mxu1 %vm360_vm1, %v1288_v8  ;;  %1073 = vmatmul.msk.bf16.vlgmr.msrb.gmra.mxu0 %vm360_vm1, %v597_v60  ;;  %v661_v8 = vrot.slane %v524_v16, 3 }
  0x2c   : > { %698 = vmatpush.bf16.msra.mxu1 %v1164_v49  ;;  %882 = vmatpush.bf16.msra.mxu0 %v1173_v9 }
  0x2d   : > { %1038 = vmatmul.msk.bf16.gmra.mxu2 %vm360_vm1, %v456_v57  ;;  %1056 = vmatmul.msk.bf16.gmra.mxu3 %vm360_vm1, %v530_v59  ;;  %v662_v12 = vor.u32 %v661_v8, %v660_v10 }
  0x2f   : > { %v663_v15 = vsel %vm590_vm2, %v659_v14, %v662_v12 }
  0x30   : > { %699 = vmatpush.bf16.msra.mxu1 %v1163_v56  ;;  %v1197_v56 = vld [vmem:[%s1436_s4] ss:$0 sm:$0xff] }
  0x34   : > { %700 = vmatpush.bf16.msra.mxu1 %v1162_v61 }
  0x38   : > { %701 = vmatpush.bf16.msra.mxu1 %v1161_v62 }
  0x3b   : > { %1020 = vmatmul.msk.bf16.gmra.mxu1 %vm360_vm1, %v317_v4  ;;  %1074 = vmatmul.msk.bf16.gmra.mxu0 %vm360_vm1, %v596_v55 }
  0x3d   : > { %1109 = vmatmul.msk.bf16.vlgmr.msrb.gmra.mxu2 %vm360_vm1, %v728_v5  ;;  %1127 = vmatmul.msk.bf16.vlgmr.msrb.gmra.mxu3 %vm360_vm1, %v792_v6 }
  0x4b   : > { %1091 = vmatmul.msk.bf16.vlgmr.msra.gmra.mxu1 %vm360_vm1, %v663_v15  ;;  %v1198_v15 = vld [vmem:[%s1438_s6] ss:$0 sm:$0xff] }
  0x4d   : > { %1110 = vmatmul.msk.bf16.gmra.mxu2 %vm360_vm1, %v727_v1  ;;  %1128 = vmatmul.msk.bf16.gmra.mxu3 %vm360_vm1, %v791_v3 }
  0x5b   : > { %1092 = vmatmul.msk.bf16.gmra.mxu1 %vm360_vm1, %v662_v12 }
  0x98   : > { %v381_v17 = vpop.f32.mrf.mxu1  ;;  %v376_v18 = vpop.f32.mrf.mxu0 }
  0xa0   : > { %v496_v13 = vpop.f32.mrf.mxu2  ;;  %v383_v16 = vpop.f32.mrf.mxu1 }
  0xa1   : > { %v570_v19 = vpop.f32.mrf.mxu3  ;;  %v378_v20 = vpop.f32.mrf.mxu0 }
  0xa8   : > { %v498_v21 = vpop.f32.mrf.mxu2  ;;  %v424_v22 = vpop.f32.mrf.mxu1 }
  0xa9   : > { %v572_v23 = vpop.f32.mrf.mxu3  ;;  %v637_v24 = vpop.f32.mrf.mxu0  ;;  %v425_v33 = vadd.f32 %v424_v22, %v376_v18 }
  0xab   : > { %v505_v35 = vadd.f32 %v496_v13, %v425_v33 }
  0xad   : > { %v579_v39 = vadd.f32 %v570_v19, %v505_v35 }
  0xaf   : > { %v646_v42 = vadd.f32 %v637_v24, %v579_v39 }
  0xb0   : > { %v501_v25 = vpop.f32.mrf.mxu2  ;;  %v426_v26 = vpop.f32.mrf.mxu1 }
  0xb1   : > { %v575_v27 = vpop.f32.mrf.mxu3  ;;  %v639_v28 = vpop.f32.mrf.mxu0  ;;  %v427_v40 = vadd.f32 %v426_v26, %v378_v20 }
  0xb3   : > { %v506_v43 = vadd.f32 %v498_v21, %v427_v40 }
  0xb5   : > { %v580_v47 = vadd.f32 %v572_v23, %v506_v43 }
  0xb7   : > { %v647_v51 = vadd.f32 %v639_v28, %v580_v47 }
  0xb8   : > { %v503_v29 = vpop.f32.mrf.mxu2  ;;  %v429_v30 = vpop.f32.mrf.mxu1 }
  0xb9   : > { %v577_v31 = vpop.f32.mrf.mxu3  ;;  %v642_v32 = vpop.f32.mrf.mxu0  ;;  %v430_v48 = vadd.f32 %v429_v30, %v381_v17 }
  0xbb   : > { %v507_v52 = vadd.f32 %v501_v25, %v430_v48 }
  0xbd   : > { %v581_v58 = vadd.f32 %v575_v27, %v507_v52 }
  0xbf   : > { %v648_v63 = vadd.f32 %v642_v32, %v581_v58 }
  0xc0   : > { %v768_v34 = vpop.f32.mrf.mxu2  ;;  %v431_v36 = vpop.f32.mrf.mxu1 }
  0xc1   : > { %v832_v37 = vpop.f32.mrf.mxu3  ;;  %v644_v38 = vpop.f32.mrf.mxu0 }
  0xc8   : > { %v770_v41 = vpop.f32.mrf.mxu2  ;;  %v703_v44 = vpop.f32.mrf.mxu1 }
  0xc9   : > { %v834_v45 = vpop.f32.mrf.mxu3  ;;  %v712_v46 = vadd.f32 %v703_v44, %v646_v42 }
  0xcb   : > { %v777_v49 = vadd.f32 %v768_v34, %v712_v46 }
  0xcd   : > { %v841_v55 = vadd.f32 %v832_v37, %v777_v49 }
  0xcf   : > { %v848_v60 = vadd.f32 %v1197_v56, %v841_v55 }
  0xd0   : > { %v773_v50 = vpop.f32.mrf.mxu2  ;;  %v705_v53 = vpop.f32.mrf.mxu1 }
  0xd1   : > { %v837_v54 = vpop.f32.mrf.mxu3  ;;  %v713_v57 = vadd.f32 %v705_v53, %v647_v51  ;;  %v851_v3 = vmax.f32 %v848_v60, 0.0 }
  0xd3   : > { %v778_v59 = vadd.f32 %v770_v41, %v713_v57 }
  0xd5   : > { %v842_v61 = vadd.f32 %v834_v45, %v778_v59 }
  0xd7   : > { %v849_v0 = vadd.f32 %v1197_v56, %v842_v61 }
  0xd8   : > { %v775_v62 = vpop.f32.mrf.mxu2  ;;  %v708_v1 = vpop.f32.mrf.mxu1 }
  0xd9   : > { %v839_v2 = vpop.f32.mrf.mxu3  ;;  %v852_v4 = vmax.f32 %v849_v0, 0.0  ;;  %v714_v5 = vadd.f32 %v708_v1, %v648_v63 }
  0xdb   : > { %v854_v6 = vpack.c.bf16 %v852_v4, %v851_v3  ;;  %v779_v7 = vadd.f32 %v773_v50, %v714_v5 }
  0xdd   : > { %1133 = vmatmul.msk.bf16.vlgmr.msra.gmra.mxu0 %vm868_vm4, %v854_v6  ;;  %v843_v8 = vadd.f32 %v837_v54, %v779_v7 }
  0xdf   : > { %v850_v11 = vadd.f32 %v1197_v56, %v843_v8 }
  0xe0   : > { %v710_v10 = vpop.f32.mrf.mxu1 }
  0xe1   : > { %v853_v12 = vmax.f32 %v850_v11, 0.0 }
  0xe3   : > { %v855_v14 = vpack.c.bf16 %v853_v12, %v853_v12 }
  0xed   : > { %1134 = vmatmul.msk.bf16.gmra.mxu0 %vm868_vm4, %v855_v14 }
 0x15a   : > { %v884_v17 = vpop.f32.mrf.mxu0 }
 0x15b   : > { %v885_v18 = vadd.f32 %v1198_v15, %v884_v17 }
 0x15d   : > { %v893_v9 = vmax.f32 %v885_v18, 0.0 }
 0x15f   : > { %897 = vst.msk [vmem:[%s298_s20] sm:$0xff] %vm896_vm5, %v893_v9 }
 0x162   : > { %v886_v13 = vpop.f32.mrf.mxu0 }
 0x163   : > { %v887_v16 = vadd.f32 %v1198_v15, %v886_v13 }
 0x165   : > { %v894_v19 = vmax.f32 %v887_v16, 0.0 }
 0x167   : > { %898 = vst.msk [vmem:[%s298_s20 + $0x8] sm:$0xff] %vm896_vm5, %v894_v19 }
 0x16a   : > { %v889_v20 = vpop.f32.mrf.mxu0 }
 0x16b   : > { %v890_v21 = vadd.f32 %v1198_v15, %v889_v20 }
 0x16d   : > { %v895_v22 = vmax.f32 %v890_v21, 0.0 }
 0x16f   : > { %899 = vst.msk [vmem:[%s298_s20 + $0x10] sm:$0xff] %vm896_vm5, %v895_v22 }
 0x172   : > { %v891_v23 = vpop.f32.mrf.mxu0 }
 0x173 PF: > { %s17_s24 = sadd.s32 1, %s1205_s24  }
 0x174   : > { %p14_p4 = scmp.ge.s32.totalorder %s17_s24, 4  }
 0x176   :  { %16 = sbr.rel (!%p14_p4) target bundleno = 1 (0x1), region = 81 }

// kernel: stem_block.2
= control target key start
LH: loop header
LB: loop body
LE: loop exit
PB: predicated region body
PF: predicated region fallthrough
CT: control target
= control target key end

     0   :  { %s3074_s30 = smov 0   ;;  %s3983_s0 = inlined_call_operand.vmem [shape: bf16[2,152,16], index: 0, kind: input, shape index: {}]   ;;  %s3984_s1 = inlined_call_operand.vmem [shape: f32[136,1], index: 1, kind: input, shape index: {}]   ;;  %s3985_s2 = inlined_call_operand.vmem [shape: bf16[64,16], index: 2, kind: input, shape index: {}]   ;;  %s3986_s3 = inlined_call_operand.vmem [shape: f32[1,16], index: 3, kind: input, shape index: {}]   ;;  %s3987_s4 = inlined_call_operand.vmem [shape: bf16[64,8], index: 4, kind: input, shape index: {}]   ;;  %s3988_s5 = inlined_call_operand.vmem [shape: f32[1,8], index: 5, kind: input, shape index: {}]   ;;  %s3989_s6 = inlined_call_operand.vmem [shape: bf16[32,16], index: 6, kind: input, shape index: {}]   ;;  %s3990_s7 = inlined_call_operand.vmem [shape: f32[1,16], index: 7, kind: input, shape index: {}]   ;;  %s3991_s8 = inlined_call_operand.vmem [shape: bf16[2,104,16], index: 8, kind: output, shape index: {0}]   ;;  %s3992_s9 = inlined_call_operand.vmem [shape: bf16[2,104,16], index: 9, kind: output, shape index: {1}]  }
   0x1 LB: > { %s2752_s10 = sadd.s32 4294967295, %s3021_s30   ;;  %p2756_p0 = scmp.ge.s32.totalorder %s3021_s30, 1  ;;  %s3021_s30 = sphi %s3074_s30, %s20_s30  }
   0x2   : > { %p290_p1 = scmp.lt.s32.totalorder %s3021_s30, 3 }
   0x4   : > { %p291_p2 = pnand %p2756_p0, %p290_p1 }
   0x5   : > { %p331_p3 = scmp.lt.s32.totalorder (!%p291_p2), %s2752_s10, 1 }
   0x6   : > { %294 = sbr.rel (%p291_p2) target bundleno = 630 (0x276), region = 52 }
   0xb   : > { %v3085_v0 = vld [vmem:[%s3984_s1 + $0x18] sm:$0xff]  ;;  %v3090_v1 = vld [vmem:[%s3984_s1 + $0x8] sm:$0xff]  ;;  %v3095_v2 = vld [vmem:[%s3984_s1] sm:$0xff]  ;;  %v3023_v3 = vmov 0   ;;  %s3998_s10 = smov (!%p331_p3, %s2752_s10), 1  ;;  %vm477_vm0 = vcmask 130048  }
   0xc   : > { %3011 = vset.pattern.permute.xlu2 %v3023_v3  ;;  %3010 = vset.pattern.permute.xlu1 %v3023_v3  ;;  %v2890_v4 = vld [vmem:[%s3985_s2] sm:$0xff]  ;;  %v2892_v5 = vld [vmem:[%s3985_s2 + $0x10] sm:$0xff]  ;;  %v2891_v6 = vld [vmem:[%s3985_s2 + $0x8] sm:$0xff]  ;;  %s2998_s25 = smul.u32 76, %s3998_s10  ;;  %vm656_vm1 = vcmask 1046528   ;;  %vm1189_vm4 = vcmask 1045504  }
   0xd   : > { %3009 = vset.pattern.permute.xlu0 %v3023_v3  ;;  %1035 = vperm.xlu1 %3010, %v3085_v0   ;;  %v2893_v7 = vld [vmem:[%s3985_s2 + $0x18] sm:$0xff]  ;;  %v3118_v8 = vld [vmem:[%s3984_s1 + $0x20] sm:$0xff]  ;;  %v3133_v12 = vld [vmem:[%s3984_s1 + $0x10] sm:$0xff]  ;;  %vm399_vm2 = vsmask.f32 7424  ;;  %vm1243_vm5 = vcmask 1044480  }
   0xe   : > { %1025 = vperm.xlu0 %3009, %v3090_v1   ;;  %1020 = vperm.xlu2 %3011, %v3095_v2   ;;  %s3123_s11 = scalar_lea.vmem %s3983_s0, %s2998_s25  ;;  %v3138_v13 = vld [vmem:[%s3984_s1 + $0x28] sm:$0xff]  ;;  %vm779_vm3 = vsmask.f32 6400  ;;  %v3158_v36 = vld [vmem:[%s3984_s1 + $0x38] sm:$0xff]  ;;  %v3164_v38 = vld [vmem:[%s3984_s1 + $0x30] sm:$0xff]  ;;  %s2999_s29 = smul.u32 52, %s3998_s10 }
   0xf   : > { %590 = vmatpush.bf16.msra.mxu1 %v2890_v4  ;;  %714 = vmatpush.bf16.msra.mxu2 %v2892_v5  ;;  %v2899_v9 = vld [vmem:[%s3123_s11] sm:$0xff]   ;;  %v3128_v11 = vld [vmem:[%s3123_s11 + $0xc] sm:$0xff]   ;;  %v3152_v35 = vld [vmem:[%s3123_s11 + $0x14] sm:$0xff]   ;;  %vm1401_vm6 = vcmask 125952   ;;  %vm2158_vm7 = vcmask 1043456   ;;  %vm2136_vm8 = vcmask 64512  }
  0x10   : > { %512 = vmatpush.bf16.msra.mxu0 %v2891_v6  ;;  %900 = vmatpush.bf16.msra.mxu3 %v2893_v7  ;;  %v2984_v10 = vld [vmem:[%s3123_s11 + $0x4] sm:$0xff]   ;;  %v401_v14 = vshrl.u32 %v2899_v9, 16  ;;  %v403_v15 = vshll.u32 %v2899_v9, 16  ;;  %v658_v18 = vrot.slane %v3128_v11, 1  ;;  %v789_v23 = vshrl.u32 %v3128_v11, 16  ;;  %v2935_v40 = vld [vmem:[%s3123_s11 + $0x10] sm:$0xff]   ;;  %s3451_s14 = scalar_lea.vmem %s3991_s8, %s2999_s29  ;;  %s3940_s28 = scalar_lea.vmem %s3992_s9, %s2999_s29 }
  0x11   : > { %v2934_v16 = vld [vmem:[%s3123_s11 + $0x8] sm:$0xff]   ;;  %v657_v17 = vrot.slane %v2984_v10, 1  ;;  %v781_v20 = vshrl.u32 %v2984_v10, 16  ;;  %v784_v22 = vshll.u32 %v2984_v10, 16  ;;  %v792_v24 = vshll.u32 %v3128_v11, 16  ;;  %v3169_v39 = vld [vmem:[%s3984_s1 + $0x40] sm:$0xff] }
  0x12   : > { %2777 = vmatmul.msk.bf16.vlgmr.msra.gmra.mxu1 %vm477_vm0, %v2899_v9  ;;  %v408_v19 = vshll.u32 %v2934_v16, 16  ;;  %v405_v21 = vrot.slane %v403_v15, 1  ;;  %v791_v30 = vrot.slane %v789_v23, 1  ;;  %v798_v41 = vshrl.u32 %v3152_v35, 16  ;;  %v2896_v43 = vld [vmem:[%s3987_s4 + $0x10] sm:$0xff]  ;;  %v2897_v44 = vld [vmem:[%s3987_s4 + $0x18] sm:$0xff] }
  0x13   : > { %v659_v25 = vsel %vm656_vm1, %v657_v17, %v658_v18  ;;  %v783_v27 = vrot.slane %v781_v20, 1  ;;  %v786_v29 = vrot.slane %v784_v22, 2  ;;  %v794_v31 = vrot.slane %v792_v24, 2  ;;  %v2895_v45 = vld [vmem:[%s3987_s4 + $0x8] sm:$0xff]  ;;  %v2894_v48 = vld [vmem:[%s3987_s4] sm:$0xff]  ;;  %1710 = vmatpush.bf16.msrb.mxu2 %v2896_v43  ;;  %v3194_v52 = vld [vmem:[%s3984_s1 + $0x50] sm:$0xff] }
  0x14   : > { %v410_v26 = vrot.slane %v408_v19, 1  ;;  %v406_v28 = vor.u32 %v405_v21, %v401_v14  ;;  %2790 = vmatmul.msk.bf16.vlgmr.msra.gmra.mxu2 %vm477_vm0, %v659_v25  ;;  %v801_v42 = vshll.u32 %v3152_v35, 16  ;;  %v412_v46 = vshrl.u32 %v2934_v16, 16  ;;  %1876 = vmatpush.bf16.msrb.mxu3 %v2897_v44  ;;  %v3199_v53 = vld [vmem:[%s3984_s1 + $0x48] sm:$0xff]  ;;  %v3204_v54 = vld [vmem:[%s3984_s1 + $0x58] sm:$0xff]  ;;  %v3224_v63 = vld [vmem:[%s3984_s1 + $0x60] sm:$0xff] }
  0x15   : > { %1040 = vperm.xlu1 %3010, %v3118_v8   ;;  %v787_v33 = vor.u32 %v786_v29, %v783_v27  ;;  %v795_v34 = vor.u32 %v794_v31, %v791_v30  ;;  %v416_v47 = vshll.u32 %v2935_v40, 16  ;;  %v660_v49 = vrot.slane %v3152_v35, 1  ;;  %1528 = vmatpush.bf16.msrb.mxu0 %v2895_v45  ;;  %v2990_v61 = vld [vmem:[%s3123_s11 + $0x1c] sm:$0xff]   ;;  %v3219_v62 = vld [vmem:[%s3984_s1 + $0x68] sm:$0xff]  ;;  %v3229_v3 = vld [vmem:[%s3984_s1 + $0x70] sm:$0xff] }
  0x16   : > { %1030 = vperm.xlu0 %3009, %v3133_v12   ;;  %1045 = vperm.xlu2 %3011, %v3138_v13   ;;  %v411_v32 = vsel %vm399_vm2, %v406_v28, %v410_v26  ;;  %v800_v50 = vrot.slane %v798_v41, 1  ;;  %v803_v51 = vrot.slane %v801_v42, 2  ;;  %v414_v55 = vor.u32 %v412_v46, %v410_v26  ;;  %v2936_v4 = vld [vmem:[%s3123_s11 + $0x18] sm:$0xff]   ;;  %v1017_v15 = vld [vmem:[%s3984_s1 + $0x80] sm:$0xff]  ;;  %v2994_v41 = vld [vmem:[%s3123_s11 + $0x2c] sm:$0xff]  }
  0x17   : > { %2764 = vmatmul.msk.bf16.vlgmr.msra.gmra.mxu0 %vm477_vm0, %v411_v32  ;;  %v796_v37 = vsel %vm779_vm3, %v787_v33, %v795_v34  ;;  %1599 = vmatpush.bf16.msrb.mxu1 %v2894_v48  ;;  %v418_v56 = vrot.slane %v416_v47, 1  ;;  %v661_v57 = vsel %vm656_vm1, %v658_v18, %v660_v49  ;;  %v807_v5 = vshrl.u32 %v2990_v61, 16  ;;  %v2992_v23 = vld [vmem:[%s3123_s11 + $0x24] sm:$0xff]  }
  0x18   : > { %2803 = vmatmul.msk.bf16.vlgmr.msra.gmra.mxu3 %vm477_vm0, %v796_v37  ;;  %v804_v58 = vor.u32 %v803_v51, %v800_v50  ;;  %v810_v6 = vshll.u32 %v2990_v61, 16  ;;  %v420_v7 = vshrl.u32 %v2935_v40, 16  ;;  %v424_v9 = vshll.u32 %v2936_v4, 16  ;;  %v2937_v24 = vld [vmem:[%s3123_s11 + $0x20] sm:$0xff]   ;;  %v2938_v42 = vld [vmem:[%s3123_s11 + $0x28] sm:$0xff]  }
  0x19   : > { %v419_v59 = vsel %vm399_vm2, %v414_v55, %v418_v56  ;;  %v662_v10 = vrot.slane %v2990_v61, 1  ;;  %v809_v11 = vrot.slane %v807_v5, 1  ;;  %v816_v25 = vshrl.u32 %v2992_v23, 16 }
  0x1a   : > { %v805_v60 = vsel %vm779_vm3, %v795_v34, %v804_v58  ;;  %v812_v14 = vrot.slane %v810_v6, 2  ;;  %v422_v17 = vor.u32 %v420_v7, %v418_v56  ;;  %v426_v18 = vrot.slane %v424_v9, 1 }
  0x1b   : > { %v663_v19 = vsel %vm656_vm1, %v660_v49, %v662_v10  ;;  %v819_v26 = vshll.u32 %v2992_v23, 16  ;;  %v428_v27 = vshrl.u32 %v2936_v4, 16  ;;  %v432_v28 = vshll.u32 %v2937_v24, 16 }
  0x1c   : > { %v813_v20 = vor.u32 %v812_v14, %v809_v11  ;;  %v427_v21 = vsel %vm399_vm2, %v422_v17, %v426_v18  ;;  %v664_v29 = vrot.slane %v2992_v23, 1  ;;  %v818_v30 = vrot.slane %v816_v25, 1  ;;  %v2940_v11 = vld [vmem:[%s3123_s11 + $0x38] sm:$0xff]   ;;  %v3287_v14 = vld [vmem:[%s3123_s11 + $0x40] sm:$0xff]  }
  0x1d   : > { %1055 = vperm.xlu1 %3010, %v3158_v36   ;;  %v821_v31 = vrot.slane %v819_v26, 2  ;;  %v430_v32 = vor.u32 %v428_v27, %v426_v18  ;;  %v434_v33 = vrot.slane %v432_v28, 1  ;;  %v825_v43 = vshrl.u32 %v2994_v41, 16 }
  0x1e   : > { %1050 = vperm.xlu0 %3009, %v3164_v38   ;;  %1060 = vperm.xlu2 %3011, %v3169_v39   ;;  %v814_v22 = vsel %vm779_vm3, %v804_v58, %v813_v20  ;;  %v665_v34 = vsel %vm656_vm1, %v662_v10, %v664_v29  ;;  %v828_v44 = vshll.u32 %v2994_v41, 16  ;;  %v436_v45 = vshrl.u32 %v2937_v24, 16 }
  0x1f   : > { %v822_v35 = vor.u32 %v821_v31, %v818_v30  ;;  %v435_v37 = vsel %vm399_vm2, %v430_v32, %v434_v33  ;;  %v440_v46 = vshll.u32 %v2938_v42, 16  ;;  %v666_v47 = vrot.slane %v2994_v41, 1  ;;  %v2997_v41 = vld [vmem:[%s3123_s11 + $0x44] sm:$0xff] }
  0x20   : > { %v827_v48 = vrot.slane %v825_v43, 1  ;;  %v830_v49 = vrot.slane %v828_v44, 2  ;;  %v438_v50 = vor.u32 %v436_v45, %v434_v33  ;;  %v444_v5 = vshrl.u32 %v2938_v42, 16 }
  0x21   : > { %v442_v51 = vrot.slane %v440_v46, 1  ;;  %v667_v55 = vsel %vm656_vm1, %v664_v29, %v666_v47  ;;  %v3293_v18 = vunpack.c.l.bf16 %v3287_v14  ;;  %v456_v26 = vshll.u32 %v2940_v11, 16 }
  0x22   : > { %2778 = vmatmul.msk.bf16.gmra.mxu1 %vm477_vm0, %v2934_v16  ;;  %v1016_v16 = vld [vmem:[%s3984_s1 + $0x78] sm:$0xff]  ;;  %v831_v56 = vor.u32 %v830_v49, %v827_v48  ;;  %v855_v43 = vshll.u32 %v2997_v41, 16  ;;  %v460_v45 = vshrl.u32 %v2940_v11, 16  ;;  %v464_v46 = vshll.u32 %v3287_v14, 16 }
  0x23   : > { %v458_v32 = vrot.slane %v456_v26, 1  ;;  %v672_v49 = vrot.slane %v2997_v41, 1 }
  0x24   : > { %2791 = vmatmul.msk.bf16.gmra.mxu2 %vm477_vm0, %v661_v57  ;;  %v443_v57 = vsel %vm399_vm2, %v438_v50, %v442_v51  ;;  %v832_v58 = vsel %vm779_vm3, %v822_v35, %v831_v56 }
  0x25   : > { %1070 = vperm.xlu1 %3010, %v3194_v52  }
  0x26   : > { %1065 = vperm.xlu0 %3009, %v3199_v53   ;;  %1075 = vperm.xlu2 %3011, %v3204_v54  }
  0x27   : > { %2765 = vmatmul.msk.bf16.gmra.mxu0 %vm477_vm0, %v419_v59  ;;  %v2995_v59 = vld [vmem:[%s3123_s11 + $0x34] sm:$0xff]  }
  0x28   : > { %2804 = vmatmul.msk.bf16.gmra.mxu3 %vm477_vm0, %v805_v60  ;;  %v2939_v60 = vld [vmem:[%s3123_s11 + $0x30] sm:$0xff]   ;;  %v834_v61 = vshrl.u32 %v2995_v59, 16  ;;  %v668_v7 = vrot.slane %v2995_v59, 1 }
  0x29   : > { %v448_v6 = vshll.u32 %v2939_v60, 16  ;;  %v452_v25 = vshrl.u32 %v2939_v60, 16 }
  0x2a   : > { %v836_v9 = vrot.slane %v834_v61, 1 }
  0x2d   : > { %1085 = vperm.xlu1 %3010, %v3219_v62  }
  0x2e   : > { %1080 = vperm.xlu0 %3009, %v3224_v63   ;;  %1090 = vperm.xlu2 %3011, %v3229_v3  }
  0x32   : > { %2779 = vmatmul.msk.bf16.gmra.mxu1 %vm477_vm0, %v2935_v40  ;;  %v823_v40 = vsel %vm779_vm3, %v813_v20, %v822_v35 }
  0x34   : > { %2792 = vmatmul.msk.bf16.gmra.mxu2 %vm477_vm0, %v663_v19 }
  0x35   : > { %1100 = vperm.xlu1 %3010, %v1017_v15   ;;  %v446_v15 = vor.u32 %v444_v5, %v442_v51  ;;  %v857_v51 = vrot.slane %v855_v43, 2 }
  0x36   : > { %1095 = vperm.xlu0 %3009, %v1016_v16   ;;  %1988 = vperm.xlu2 %3011, %v3090_v1   ;;  %v450_v16 = vrot.slane %v448_v6, 1 }
  0x37   : > { %2766 = vmatmul.msk.bf16.gmra.mxu0 %vm477_vm0, %v427_v21 }
  0x38   : > { %2805 = vmatmul.msk.bf16.gmra.mxu3 %vm477_vm0, %v814_v22  ;;  %v451_v19 = vsel %vm399_vm2, %v446_v15, %v450_v16  ;;  %v454_v31 = vor.u32 %v452_v25, %v450_v16 }
  0x3a   : > { %v459_v35 = vsel %vm399_vm2, %v454_v31, %v458_v32 }
  0x3d   : > { %1998 = vperm.xlu1 %3010, %v3085_v0  }
  0x3e   : > { %1993 = vperm.xlu0 %3009, %v3133_v12   ;;  %2003 = vperm.xlu2 %3011, %v3118_v8  }
  0x42   : > { %2780 = vmatmul.msk.bf16.gmra.mxu1 %vm477_vm0, %v2936_v4  ;;  %v837_v4 = vshll.u32 %v2995_v59, 16 }
  0x44   : > { %2793 = vmatmul.msk.bf16.gmra.mxu2 %vm477_vm0, %v665_v34  ;;  %v839_v10 = vrot.slane %v837_v4, 2 }
  0x45   : > { %2008 = vperm.xlu1 %3010, %v3138_v13  }
  0x46   : > { %1983 = vperm.xlu0 %3009, %v3095_v2   ;;  %2013 = vperm.xlu2 %3011, %v3164_v38   ;;  %v840_v17 = vor.u32 %v839_v10, %v836_v9  ;;  %v468_v9 = vshrl.u32 %v3287_v14, 16 }
  0x47   : > { %2767 = vmatmul.msk.bf16.gmra.mxu0 %vm477_vm0, %v435_v37 }
  0x48   : > { %2806 = vmatmul.msk.bf16.gmra.mxu3 %vm477_vm0, %v823_v40  ;;  %v841_v21 = vsel %vm779_vm3, %v831_v56, %v840_v17  ;;  %v466_v56 = vrot.slane %v464_v46, 1 }
  0x4d   : > { %2023 = vperm.xlu1 %3010, %v3169_v39  }
  0x4e   : > { %2018 = vperm.xlu0 %3009, %v3158_v36   ;;  %2028 = vperm.xlu2 %3011, %v3199_v53  }
  0x52   : > { %2781 = vmatmul.msk.bf16.gmra.mxu1 %vm477_vm0, %v2937_v24 }
  0x54   : > { %2794 = vmatmul.msk.bf16.gmra.mxu2 %vm477_vm0, %v667_v55  ;;  %v462_v55 = vor.u32 %v460_v45, %v458_v32 }
  0x55   : > { %2038 = vperm.xlu1 %3010, %v3204_v54  }
  0x56   : > { %2033 = vperm.xlu0 %3009, %v3194_v52   ;;  %2043 = vperm.xlu2 %3011, %v3224_v63  }
  0x57   : > { %2768 = vmatmul.msk.bf16.gmra.mxu0 %vm477_vm0, %v443_v57 }
  0x58   : > { %2807 = vmatmul.msk.bf16.gmra.mxu3 %vm477_vm0, %v832_v58 }
  0x5d   : > { %2053 = vperm.xlu1 %3010, %v3229_v3   ;;  %v669_v3 = vsel %vm656_vm1, %v666_v47, %v668_v7 }
  0x5e   : > { %2048 = vperm.xlu0 %3009, %v3219_v62   ;;  %1312 = vperm.xlu2 %3011, %v3095_v2   ;;  %v2929_v62 = vunpack.c.h.bf16 %v2940_v11 }
  0x60   : > { %v643_v22 = vpack.c.bf16 %v3293_v18, %v2929_v62 }
  0x62   : > { %2782 = vmatmul.msk.bf16.gmra.mxu1 %vm477_vm0, %v2938_v42  ;;  %v843_v23 = vshrl.u32 %v643_v22, 16  ;;  %v846_v24 = vshll.u32 %v643_v22, 16  ;;  %v670_v28 = vrot.slane %v643_v22, 1  ;;  %v852_v42 = vshrl.u32 %v2997_v41, 16 }
  0x64   : > { %2795 = vmatmul.msk.bf16.gmra.mxu2 %vm477_vm0, %v669_v3  ;;  %v845_v29 = vrot.slane %v843_v23, 1  ;;  %v848_v30 = vrot.slane %v846_v24, 2  ;;  %v671_v33 = vsel %vm656_vm1, %v668_v7, %v670_v28  ;;  %v854_v50 = vrot.slane %v852_v42, 1 }
  0x65   : > { %1322 = vperm.xlu1 %3010, %v3133_v12   ;;  %v673_v57 = vsel %vm656_vm1, %v670_v28, %v672_v49 }
  0x66   : > { %1317 = vperm.xlu0 %3009, %v3090_v1   ;;  %1327 = vperm.xlu2 %3011, %v3085_v0   ;;  %v849_v34 = vor.u32 %v848_v30, %v845_v29  ;;  %v858_v58 = vor.u32 %v857_v51, %v854_v50 }
  0x67   : > { %2769 = vmatmul.msk.bf16.gmra.mxu0 %vm477_vm0, %v451_v19 }
  0x68   : > { %v3299_v20 = vpop.permute.xlu2 %1020  ;;  %2808 = vmatmul.msk.bf16.gmra.mxu3 %vm477_vm0, %v841_v21  ;;  %v850_v40 = vsel %vm779_vm3, %v840_v17, %v849_v34  ;;  %v859_v5 = vsel %vm779_vm3, %v849_v34, %v858_v58 }
  0x6d   : > { %1337 = vperm.xlu1 %3010, %v3138_v13  }
  0x6e   : > { %1332 = vperm.xlu0 %3009, %v3118_v8   ;;  %1342 = vperm.xlu2 %3011, %v3164_v38  }
  0x70   : > { %v3308_v27 = vpop.permute.xlu2 %1045 }
  0x72   : > { %2783 = vmatmul.msk.bf16.gmra.mxu1 %vm477_vm0, %v2939_v60  ;;  %v467_v60 = vsel %vm399_vm2, %v462_v55, %v466_v56 }
  0x74   : > { %2796 = vmatmul.msk.bf16.gmra.mxu2 %vm477_vm0, %v671_v33 }
  0x75   : > { %1352 = vperm.xlu1 %3010, %v3169_v39  }
  0x76   : > { %1347 = vperm.xlu0 %3009, %v3158_v36   ;;  %1357 = vperm.xlu2 %3011, %v3199_v53  }
  0x77   : > { %2770 = vmatmul.msk.bf16.gmra.mxu0 %vm477_vm0, %v459_v35 }
  0x78   : > { %v3317_v37 = vpop.permute.xlu2 %1060  ;;  %2809 = vmatmul.msk.bf16.gmra.mxu3 %vm477_vm0, %v850_v40 }
  0x7d   : > { %1367 = vperm.xlu1 %3010, %v3204_v54  }
  0x7e   : > { %1362 = vperm.xlu0 %3009, %v3194_v52   ;;  %1372 = vperm.xlu2 %3011, %v3224_v63  }
  0x7f   : > { %v3326_v44 = vpop.permute.xlu1 %1035 }
  0x80   : > { %v3329_v47 = vpop.permute.xlu0 %1025  ;;  %v3331_v48 = vpop.permute.xlu2 %1075 }
  0x82   : > { %2784 = vmatmul.msk.bf16.gmra.mxu1 %vm477_vm0, %v2940_v11 }
  0x84   : > { %2797 = vmatmul.msk.bf16.gmra.mxu2 %vm477_vm0, %v673_v57 }
  0x85   : > { %2567 = vperm.xlu1 %3010, %v3090_v1  }
  0x86   : > { %2562 = vperm.xlu0 %3009, %v3095_v2   ;;  %2572 = vperm.xlu2 %3011, %v3133_v12   ;;  %v393_v2 = vpack.c.bf16 %v3293_v18, %v3293_v18 }
  0x87   : > { %v3338_v59 = vpop.permute.xlu1 %1040  ;;  %2771 = vmatmul.msk.bf16.gmra.mxu0 %vm477_vm0, %v467_v60 }
  0x88   : > { %v3342_v61 = vpop.permute.xlu0 %1030  ;;  %v3344_v4 = vpop.permute.xlu2 %1090  ;;  %2810 = vmatmul.msk.bf16.gmra.mxu3 %vm477_vm0, %v859_v5 }
  0x8d   : > { %2582 = vperm.xlu1 %3010, %v3118_v8  }
  0x8e   : > { %2577 = vperm.xlu0 %3009, %v3085_v0   ;;  %2587 = vperm.xlu2 %3011, %v3138_v13   ;;  %v470_v0 = vor.u32 %v468_v9, %v466_v56 }
  0x8f   : > { %v3352_v1 = vpop.permute.xlu1 %1055  ;;  %v592_v7 = vpop.f32.mrf.mxu1 }
  0x90   : > { %v3356_v12 = vpop.permute.xlu0 %1050  ;;  %v3358_v6 = vpop.permute.xlu2 %1988 }
  0x92   : > { %2785 = vmatmul.msk.bf16.gmra.mxu1 %vm477_vm0, %v393_v2 }
  0x94   : > { %v514_v13 = vpop.f32.mrf.mxu0  ;;  %2798 = vmatmul.msk.bf16.gmra.mxu2 %vm477_vm0, %v672_v49 }
  0x95   : > { %2597 = vperm.xlu1 %3010, %v3158_v36   ;;  %v593_v16 = vadd.f32 %v592_v7, %v514_v13 }
  0x96   : > { %2592 = vperm.xlu0 %3009, %v3164_v38   ;;  %2602 = vperm.xlu2 %3011, %v3169_v39  }
  0x97   : > { %v3365_v8 = vpop.permute.xlu1 %1070  ;;  %v594_v15 = vpop.f32.mrf.mxu1  ;;  %2772 = vmatmul.msk.bf16.gmra.mxu0 %vm477_vm0, %v470_v0 }
  0x98   : > { %v3368_v10 = vpop.permute.xlu0 %1065  ;;  %v3370_v11 = vpop.permute.xlu2 %2003  ;;  %2811 = vmatmul.msk.bf16.gmra.mxu3 %vm477_vm0, %v858_v58 }
  0x99   : > { %v716_v14 = vpop.f32.mrf.mxu2 }
  0x9a   : > { %v760_v39 = vadd.f32 %v716_v14, %v593_v16 }
  0x9b   : > { %v902_v17 = vpop.f32.mrf.mxu3 }
  0x9c   : > { %v516_v38 = vpop.f32.mrf.mxu0  ;;  %v946_v22 = vadd.f32 %v902_v17, %v760_v39 }
  0x9d   : > { %2612 = vperm.xlu1 %3010, %v3194_v52   ;;  %v595_v21 = vadd.f32 %v594_v15, %v516_v38  ;;  %v3386_v52 = vld [vmem:[%s3986_s3] ss:$0 sm:$0xff] }
  0x9e   : > { %2607 = vperm.xlu0 %3009, %v3199_v53   ;;  %2617 = vperm.xlu2 %3011, %v3204_v54   ;;  %v967_v23 = vadd.f32 %v3386_v52, %v946_v22 }
  0x9f   : > { %v3377_v36 = vpop.permute.xlu1 %1085  ;;  %v597_v62 = vpop.f32.mrf.mxu1 }
  0xa0   : > { %v3379_v3 = vpop.permute.xlu0 %1080  ;;  %v3381_v18 = vpop.permute.xlu2 %2013  ;;  %v984_v32 = vmax.f32 %v967_v23, 0.0 }
  0xa1   : > { %v718_v19 = vpop.f32.mrf.mxu2 }
  0xa2   : > { %v761_v24 = vadd.f32 %v718_v19, %v595_v21  ;;  %v1103_v42 = vmul.f32 %v3299_v20, %v984_v32 }
  0xa3   : > { %v904_v26 = vpop.f32.mrf.mxu3 }
  0xa4   : > { %v519_v54 = vpop.f32.mrf.mxu0  ;;  %v947_v30 = vadd.f32 %v904_v26, %v761_v24  ;;  %v1135_v58 = vrot.slane %v1103_v42, 1 }
  0xa5   : > { %v598_v29 = vadd.f32 %v597_v62, %v519_v54 }
  0xa6   : > { %2622 = vperm.xlu0 %3009, %v3224_v63   ;;  %v968_v34 = vadd.f32 %v3386_v52, %v947_v30 }
  0xa7   : > { %v3389_v53 = vpop.permute.xlu1 %1100  ;;  %v599_v28 = vpop.f32.mrf.mxu1 }
  0xa8   : > { %v3392_v25 = vpop.permute.xlu0 %1095  ;;  %v3394_v33 = vpop.permute.xlu2 %2028  ;;  %v985_v35 = vmax.f32 %v968_v34, 0.0 }
  0xa9   : > { %v721_v31 = vpop.f32.mrf.mxu2 }
  0xaa   : > { %v762_v63 = vadd.f32 %v721_v31, %v598_v29  ;;  %v3401_v43 = vmul.f32 %v3329_v47, %v985_v35 }
  0xab   : > { %v907_v46 = vpop.f32.mrf.mxu3 }
  0xac   : > { %v521_v41 = vpop.f32.mrf.mxu0  ;;  %v948_v50 = vadd.f32 %v907_v46, %v762_v63  ;;  %v3406_v51 = vpack.c.bf16 %v3401_v43, %v1103_v42  ;;  %v1136_v20 = vrot.slane %v3401_v43, 1  ;;  %v1190_v15 = vrot.slane %v3401_v43, 2 }
  0xad   : > { %v600_v56 = vadd.f32 %v599_v28, %v521_v41  ;;  %v1244_v22 = vrot.slane %v3401_v43, 3 }
  0xae   : > { %v969_v57 = vadd.f32 %v3386_v52, %v948_v50  ;;  %2828 = vmatmul.msk.bf16.vlgmr.msrb.gmra.mxu1 %vm477_vm0, %v3406_v51  ;;  %v1137_v13 = vsel %vm656_vm1, %v1135_v58, %v1136_v20  ;;  %v1431_v29 = vshll.u32 %v3406_v51, 16  ;;  %v1429_v58 = vshrl.u32 %v3406_v51, 16 }
  0xaf   : > { %v3397_v40 = vpop.permute.xlu1 %1998  ;;  %v602_v49 = vpop.f32.mrf.mxu1  ;;  %v1175_v19 = vmax.f32 %v1103_v42, %v1137_v13 }
  0xb0   : > { %v3403_v45 = vpop.permute.xlu0 %1993  ;;  %v3412_v47 = vpop.permute.xlu2 %2043  ;;  %v986_v60 = vmax.f32 %v969_v57, 0.0 }
  0xb1   : > { %v723_v55 = vpop.f32.mrf.mxu2 }
  0xb2   : > { %v3417_v7 = vmul.f32 %v3342_v61, %v986_v60  ;;  %v763_v9 = vadd.f32 %v723_v55, %v600_v56  ;;  %v1433_v56 = vrot.slane %v1431_v29, 1 }
  0xb3   : > { %v909_v14 = vpop.f32.mrf.mxu3 }
  0xb4   : > { %v524_v2 = vpop.f32.mrf.mxu0  ;;  %v1191_v38 = vrot.slane %v3417_v7, 2  ;;  %v3993_v39 = vrot.slane %v3417_v7, 3  ;;  %v949_v61 = vadd.f32 %v909_v14, %v763_v9 }
  0xb5   : > { %v603_v17 = vadd.f32 %v602_v49, %v524_v2  ;;  %v1640_v49 = vpack.c.bf16 %v3417_v7, %v3401_v43 }
  0xb6   : > { %v1192_v21 = vsel %vm1189_vm4, %v1190_v15, %v1191_v38  ;;  %v970_v54 = vadd.f32 %v3386_v52, %v949_v61  ;;  %v1246_v24 = vsel %vm1243_vm5, %v1244_v22, %v3993_v39 }
  0xb7   : > { %v3414_v5 = vpop.permute.xlu1 %2008  ;;  %v604_v16 = vpop.f32.mrf.mxu1  ;;  %v1230_v23 = vmax.f32 %v1175_v19, %v1192_v21  ;;  %v1769_v15 = vshrl.u32 %v1640_v49, 16  ;;  %v1772_v14 = vshll.u32 %v1640_v49, 16  ;;  %v1658_v21 = vrot.slane %v1640_v49, 1 }
  0xb8   : > { %v3419_v0 = vpop.permute.xlu0 %1983  ;;  %v987_v26 = vmax.f32 %v970_v54, 0.0  ;;  %v1313_v34 = vpop.permute.xlu2 %1312 }
  0xb9   : > { %v726_v62 = vpop.f32.mrf.mxu2  ;;  %v1284_v30 = vmax.f32 %v1230_v23, %v1246_v24 }
  0xba   : > { %v764_v28 = vadd.f32 %v726_v62, %v603_v17  ;;  %v3440_v35 = vmul.f32 %v3326_v44, %v987_v26  ;;  %v1138_v17 = vrot.slane %v3417_v7, 1  ;;  %v1434_v62 = vor.u32 %v1433_v56, %v1429_v58 }
  0xbb   : > { %v1375_v41 = vmul.f32 %v1313_v34, %v1284_v30  ;;  %v912_v42 = vpop.f32.mrf.mxu3  ;;  %v1774_v34 = vrot.slane %v1772_v14, 2 }
  0xbc   : > { %v526_v32 = vpop.f32.mrf.mxu0  ;;  %v950_v50 = vadd.f32 %v912_v42, %v764_v28  ;;  %v3455_v44 = vpack.c.bf16 %v3440_v35, %v3417_v7  ;;  %v1140_v13 = vrot.slane %v3440_v35, 1  ;;  %v1193_v56 = vrot.slane %v3440_v35, 2 }
  0xbd   : > { %v1388_v57 = vpack.c.bf16 %v1375_v41, %v1375_v41  ;;  %v605_v60 = vadd.f32 %v604_v16, %v526_v32  ;;  %v1771_v32 = vrot.slane %v1769_v15, 1 }
  0xbe   : > { %v971_v2 = vadd.f32 %v3386_v52, %v950_v50  ;;  %2829 = vmatmul.msk.bf16.gmra.mxu1 %vm477_vm0, %v3455_v44  ;;  %v1436_v9 = vshll.u32 %v3455_v44, 16  ;;  %v1141_v26 = vsel %vm656_vm1, %v1138_v17, %v1140_v13 }
  0xbf   : > { %v3437_v31 = vpop.permute.xlu1 %2023  ;;  %v607_v46 = vpop.f32.mrf.mxu1  ;;  %1402 = vst.msk [vmem:[%s3451_s14] sm:$0xf] %vm1401_vm6, %v1388_v57  ;;  %v1247_v57 = vrot.slane %v3440_v35, 3 }
  0xc0   : > { %v3442_v63 = vpop.permute.xlu0 %2018  ;;  %v988_v61 = vmax.f32 %v971_v2, 0.0  ;;  %v3466_v19 = vrot.slane %v1436_v9, 1 }
  0xc1   : > { %v728_v55 = vpop.f32.mrf.mxu2 }
  0xc2   : > { %v3471_v22 = vmul.f32 %v3338_v59, %v988_v61  ;;  %v765_v54 = vadd.f32 %v728_v55, %v605_v60  ;;  %v1439_v24 = vsel %vm399_vm2, %v1434_v62, %v3466_v19  ;;  %v1139_v59 = vsel %vm656_vm1, %v1136_v20, %v1138_v17 }
  0xc3   : > { %v914_v29 = vpop.f32.mrf.mxu3  ;;  %2816 = vmatmul.msk.bf16.vlgmr.msrb.gmra.mxu0 %vm477_vm0, %v1439_v24  ;;  %v1177_v55 = vmax.f32 %v3417_v7, %v1141_v26 }
  0xc4   : > { %v529_v16 = vpop.f32.mrf.mxu0  ;;  %v951_v41 = vadd.f32 %v914_v29, %v765_v54  ;;  %v3484_v49 = vpack.c.bf16 %v3471_v22, %v3440_v35  ;;  %v1195_v50 = vrot.slane %v3471_v22, 2  ;;  %v1142_v58 = vrot.slane %v3471_v22, 1 }
  0xc5   : > { %v608_v28 = vadd.f32 %v607_v46, %v529_v16  ;;  %v1249_v46 = vrot.slane %v3471_v22, 3 }
  0xc6   : > { %v972_v20 = vadd.f32 %v3386_v52, %v951_v41  ;;  %v3994_v60 = vrot.slane %v3484_v49, 1  ;;  %v1777_v2 = vshrl.u32 %v3484_v49, 16  ;;  %v1780_v9 = vshll.u32 %v3484_v49, 16 }
  0xc7   : > { %v3468_v51 = vpop.permute.xlu1 %2038  ;;  %v609_v30 = vpop.f32.mrf.mxu1  ;;  %v1196_v14 = vsel %vm1189_vm4, %v1193_v56, %v1195_v50  ;;  %v1250_v17 = vsel %vm1243_vm5, %v1247_v57, %v1249_v46  ;;  %v1143_v61 = vsel %vm656_vm1, %v1140_v13, %v1142_v58  ;;  %v1775_v13 = vor.u32 %v1774_v34, %v1771_v32 }
  0xc8   : > { %v3473_v23 = vpop.permute.xlu0 %2033  ;;  %v989_v62 = vmax.f32 %v972_v20, 0.0  ;;  %v1660_v16 = vsel %vm656_vm1, %v1658_v21, %v3994_v60  ;;  %v1779_v54 = vrot.slane %v1777_v2, 1  ;;  %v1782_v24 = vrot.slane %v1780_v9, 2 }
  0xc9   : > { %v731_v42 = vpop.f32.mrf.mxu2  ;;  %2840 = vmatmul.msk.bf16.vlgmr.msrb.gmra.mxu2 %vm477_vm0, %v1660_v16  ;;  %v1232_v41 = vmax.f32 %v1177_v55, %v1196_v14  ;;  %v1194_v21 = vsel %vm1189_vm4, %v1191_v38, %v1193_v56  ;;  %v1176_v60 = vmax.f32 %v3401_v43, %v1139_v59  ;;  %v1440_v43 = vshrl.u32 %v3455_v44, 16 }
  0xca   : > { %v766_v15 = vadd.f32 %v731_v42, %v608_v28  ;;  %v1178_v28 = vmax.f32 %v3440_v35, %v1143_v61  ;;  %v3507_v42 = vmul.f32 %v3308_v27, %v989_v62  ;;  %v3511_v20 = vor.u32 %v1782_v24, %v1779_v54 }
  0xcb   : > { %v917_v2 = vpop.f32.mrf.mxu3  ;;  %v1286_v16 = vmax.f32 %v1232_v41, %v1250_v17  ;;  %v1231_v14 = vmax.f32 %v1176_v60, %v1194_v21  ;;  %v1442_v54 = vor.u32 %v1440_v43, %v3466_v19  ;;  %v1328_v43 = vpop.permute.xlu2 %1327 }
  0xcc   : > { %v531_v29 = vpop.f32.mrf.mxu0  ;;  %v952_v55 = vadd.f32 %v917_v2, %v766_v15  ;;  %v1784_v35 = vsel %vm779_vm3, %v1775_v13, %v3511_v20  ;;  %v3521_v27 = vpack.c.bf16 %v3507_v42, %v3471_v22  ;;  %v1144_v38 = vrot.slane %v3507_v42, 1 }
  0xcd   : > { %v610_v34 = vadd.f32 %v609_v30, %v531_v29  ;;  %2852 = vmatmul.msk.bf16.vlgmr.msrb.gmra.mxu3 %vm477_vm0, %v1784_v35  ;;  %v1197_v56 = vrot.slane %v3507_v42, 2  ;;  %v1251_v15 = vrot.slane %v3507_v42, 3  ;;  %v3995_v30 = vrot.slane %v3417_v7, 3 }
  0xce   : > { %v973_v17 = vadd.f32 %v3386_v52, %v952_v55  ;;  %2830 = vmatmul.msk.bf16.gmra.mxu1 %vm477_vm0, %v3521_v27  ;;  %v1444_v59 = vshll.u32 %v3521_v27, 16  ;;  %v1145_v2 = vsel %vm656_vm1, %v1142_v58, %v1144_v38 }
  0xcf   : > { %v3503_v26 = vpop.permute.xlu1 %2053  ;;  %v612_v9 = vpop.f32.mrf.mxu1  ;;  %v1248_v61 = vsel %vm1243_vm5, %v3995_v30, %v1247_v57  ;;  %v1198_v60 = vsel %vm1189_vm4, %v1195_v50, %v1197_v56  ;;  %v1252_v57 = vsel %vm1243_vm5, %v1249_v46, %v1251_v15 }
  0xd0   : > { %v3509_v39 = vpop.permute.xlu0 %2048  ;;  %v990_v62 = vmax.f32 %v973_v17, 0.0  ;;  %v3537_v24 = vrot.slane %v1444_v59, 1  ;;  %v1233_v29 = vmax.f32 %v1178_v28, %v1198_v60  ;;  %v1285_v21 = vmax.f32 %v1231_v14, %v1248_v61 }
  0xd1   : > { %v733_v32 = vpop.f32.mrf.mxu2 }
  0xd2   : > { %v767_v41 = vadd.f32 %v733_v32, %v610_v34  ;;  %v3541_v55 = vmul.f32 %v3356_v12, %v990_v62  ;;  %v1447_v50 = vsel %vm399_vm2, %v1442_v54, %v3537_v24  ;;  %v1287_v32 = vmax.f32 %v1233_v29, %v1252_v57 }
  0xd3   : > { %v919_v17 = vpop.f32.mrf.mxu3  ;;  %2817 = vmatmul.msk.bf16.gmra.mxu0 %vm477_vm0, %v1447_v50 }
  0xd4   : > { %v534_v44 = vpop.f32.mrf.mxu0  ;;  %v953_v58 = vadd.f32 %v919_v17, %v767_v41  ;;  %v3549_v12 = vpack.c.bf16 %v3541_v55, %v3507_v42  ;;  %v1199_v30 = vrot.slane %v3541_v55, 2  ;;  %v1253_v61 = vrot.slane %v3541_v55, 3 }
  0xd5   : > { %v613_v46 = vadd.f32 %v612_v9, %v534_v44  ;;  %v1146_v54 = vrot.slane %v3541_v55, 1  ;;  %v1378_v29 = vmul.f32 %v1328_v43, %v1287_v32 }
  0xd6   : > { %v974_v60 = vadd.f32 %v3386_v52, %v953_v58  ;;  %v1661_v62 = vrot.slane %v3549_v12, 1  ;;  %v1786_v9 = vshrl.u32 %v3549_v12, 16 }
  0xd7   : > { %v1323_v13 = vpop.permute.xlu1 %1322  ;;  %v614_v28 = vpop.f32.mrf.mxu1  ;;  %v1147_v17 = vsel %vm656_vm1, %v1144_v38, %v1146_v54 }
  0xd8   : > { %v1377_v7 = vmul.f32 %v1323_v13, %v1286_v16  ;;  %v1318_v35 = vpop.permute.xlu0 %1317  ;;  %v1179_v16 = vmax.f32 %v3471_v22, %v1145_v2  ;;  %v1200_v22 = vsel %vm1189_vm4, %v1197_v56, %v1199_v30  ;;  %v991_v41 = vmax.f32 %v974_v60, 0.0 }
  0xd9   : > { %v1376_v19 = vmul.f32 %v1318_v35, %v1285_v21  ;;  %v736_v14 = vpop.f32.mrf.mxu2  ;;  %v3996_v13 = vrot.slane %v3484_v49, 1  ;;  %v1391_v2 = vpack.c.bf16 %v1378_v29, %v1378_v29  ;;  %v1254_v35 = vsel %vm1243_vm5, %v1251_v15, %v1253_v61 }
  0xda   : > { %v1390_v34 = vpack.c.bf16 %v1377_v7, %v1377_v7  ;;  %v1234_v44 = vmax.f32 %v1179_v16, %v1200_v22  ;;  %v768_v7 = vadd.f32 %v736_v14, %v613_v46  ;;  %v1788_v57 = vrot.slane %v1786_v9, 1 }
  0xdb   : > { %v1389_v59 = vpack.c.bf16 %v1376_v19, %v1376_v19  ;;  %v1662_v21 = vsel %vm656_vm1, %v3996_v13, %v1661_v62  ;;  %v1789_v56 = vshll.u32 %v3549_v12, 16  ;;  %v3572_v19 = vmul.f32 %v3352_v1, %v991_v41  ;;  %1405 = vst.msk [vmem:[%s3451_s14 + $0xc] sm:$0xf] %vm1401_vm6, %v1391_v2 }
  0xdc   : > { %1404 = vst.msk [vmem:[%s3451_s14 + $0x8] sm:$0xf] %vm1401_vm6, %v1390_v34  ;;  %2841 = vmatmul.msk.bf16.gmra.mxu2 %vm477_vm0, %v1662_v21  ;;  %v536_v50 = vpop.f32.mrf.mxu0  ;;  %v1288_v49 = vmax.f32 %v1234_v44, %v1254_v35  ;;  %v922_v34 = vpop.f32.mrf.mxu3  ;;  %v1180_v46 = vmax.f32 %v3507_v42, %v1147_v17 }
  0xdd   : > { %1403 = vst.msk [vmem:[%s3451_s14 + $0x4] sm:$0xf] %vm1401_vm6, %v1389_v59  ;;  %v1791_v58 = vrot.slane %v1789_v56, 2  ;;  %v1201_v16 = vrot.slane %v3572_v19, 2  ;;  %v1255_v15 = vrot.slane %v3572_v19, 3  ;;  %v954_v1 = vadd.f32 %v922_v34, %v768_v7 }
  0xde   : > { %v3584_v38 = vpack.c.bf16 %v3572_v19, %v3541_v55  ;;  %v615_v9 = vadd.f32 %v614_v28, %v536_v50  ;;  %v1148_v41 = vrot.slane %v3572_v19, 1  ;;  %v1448_v28 = vshrl.u32 %v3521_v27, 16 }
  0xdf   : > { %v617_v14 = vpop.f32.mrf.mxu1  ;;  %v3580_v60 = vor.u32 %v1791_v58, %v1788_v57  ;;  %v1202_v29 = vsel %vm1189_vm4, %v1199_v30, %v1201_v16  ;;  %v975_v21 = vadd.f32 %v3386_v52, %v954_v1  ;;  %v1256_v44 = vsel %vm1243_vm5, %v1253_v61, %v1255_v15  ;;  %v1338_v50 = vpop.permute.xlu1 %1337 }
  0xe0   : > { %v1333_v32 = vpop.permute.xlu0 %1332  ;;  %v1235_v13 = vmax.f32 %v1180_v46, %v1202_v29  ;;  %2831 = vmatmul.msk.bf16.gmra.mxu1 %vm477_vm0, %v3584_v38  ;;  %v1452_v30 = vshll.u32 %v3584_v38, 16  ;;  %v1149_v17 = vsel %vm656_vm1, %v1146_v54, %v1148_v41 }
  0xe1   : > { %v1379_v43 = vmul.f32 %v1333_v32, %v1288_v49  ;;  %v738_v59 = vpop.f32.mrf.mxu2  ;;  %v1793_v42 = vsel %vm779_vm3, %v3511_v20, %v3580_v60  ;;  %v992_v7 = vmax.f32 %v975_v21, 0.0  ;;  %v1450_v20 = vor.u32 %v1448_v28, %v3537_v24 }
  0xe2   : > { %2853 = vmatmul.msk.bf16.gmra.mxu3 %vm477_vm0, %v1793_v42  ;;  %v1289_v2 = vmax.f32 %v1235_v13, %v1256_v44  ;;  %v769_v57 = vadd.f32 %v738_v59, %v615_v9  ;;  %v3601_v56 = vrot.slane %v1452_v30, 1  ;;  %v1181_v54 = vmax.f32 %v3541_v55, %v1149_v17 }
  0xe3   : > { %v1392_v22 = vpack.c.bf16 %v1379_v43, %v1379_v43  ;;  %v3605_v32 = vmul.f32 %v3317_v37, %v992_v7 }
  0xe4   : > { %v539_v35 = vpop.f32.mrf.mxu0  ;;  %v1380_v61 = vmul.f32 %v1338_v50, %v1289_v2  ;;  %v924_v49 = vpop.f32.mrf.mxu3  ;;  %v1455_v58 = vsel %vm399_vm2, %v1450_v20, %v3601_v56 }
  0xe5   : > { %1406 = vst.msk [vmem:[%s3451_s14 + $0x10] sm:$0xf] %vm1401_vm6, %v1392_v22  ;;  %v955_v34 = vadd.f32 %v924_v49, %v769_v57  ;;  %v1203_v59 = vrot.slane %v3605_v32, 2  ;;  %v1257_v24 = vrot.slane %v3605_v32, 3  ;;  %v618_v1 = vadd.f32 %v617_v14, %v539_v35  ;;  %2818 = vmatmul.msk.bf16.gmra.mxu0 %vm477_vm0, %v1455_v58  ;;  %v1343_v2 = vpop.permute.xlu2 %1342 }
  0xe6   : > { %v1393_v46 = vpack.c.bf16 %v1380_v61, %v1380_v61  ;;  %v1150_v37 = vrot.slane %v3605_v32, 1  ;;  %v3617_v22 = vpack.c.bf16 %v3605_v32, %v3572_v19 }
  0xe7   : > { %v619_v27 = vpop.f32.mrf.mxu1  ;;  %v976_v29 = vadd.f32 %v3386_v52, %v955_v34  ;;  %v1204_v9 = vsel %vm1189_vm4, %v1201_v16, %v1203_v59  ;;  %v1258_v42 = vsel %vm1243_vm5, %v1255_v15, %v1257_v24 }
  0xe8   : > { %1407 = vst.msk [vmem:[%s3451_s14 + $0x14] sm:$0xf] %vm1401_vm6, %v1393_v46  ;;  %v1236_v13 = vmax.f32 %v1181_v54, %v1204_v9  ;;  %v1663_v14 = vrot.slane %v3617_v22, 1  ;;  %v1795_v28 = vshrl.u32 %v3617_v22, 16  ;;  %v1798_v30 = vshll.u32 %v3617_v22, 16 }
  0xe9   : > { %v741_v43 = vpop.f32.mrf.mxu2  ;;  %v993_v21 = vmax.f32 %v976_v29, 0.0  ;;  %v1151_v7 = vsel %vm656_vm1, %v1148_v41, %v1150_v37  ;;  %v1456_v54 = vshrl.u32 %v3584_v38, 16 }
  0xea   : > { %v770_v44 = vadd.f32 %v741_v43, %v618_v1  ;;  %v1290_v35 = vmax.f32 %v1236_v13, %v1258_v42  ;;  %v1664_v16 = vsel %vm656_vm1, %v1661_v62, %v1663_v14  ;;  %v1797_v57 = vrot.slane %v1795_v28, 1  ;;  %v1348_v28 = vpop.permute.xlu0 %1347 }
  0xeb   : > { %v3628_v50 = vmul.f32 %v3368_v10, %v993_v21  ;;  %v1800_v20 = vrot.slane %v1798_v30, 2  ;;  %v1182_v34 = vmax.f32 %v3572_v19, %v1151_v7  ;;  %v1458_v30 = vor.u32 %v1456_v54, %v3601_v56 }
  0xec   : > { %v541_v55 = vpop.f32.mrf.mxu0  ;;  %2842 = vmatmul.msk.bf16.gmra.mxu2 %vm477_vm0, %v1664_v16  ;;  %v927_v15 = vpop.f32.mrf.mxu3  ;;  %v1381_v61 = vmul.f32 %v1343_v2, %v1290_v35 }
  0xed   : > { %v1205_v49 = vrot.slane %v3628_v50, 2  ;;  %v1259_v41 = vrot.slane %v3628_v50, 3  ;;  %v956_v58 = vadd.f32 %v927_v15, %v770_v44  ;;  %v3639_v43 = vor.u32 %v1800_v20, %v1797_v57 }
  0xee   : > { %v3643_v12 = vpack.c.bf16 %v3628_v50, %v3605_v32  ;;  %v1394_v62 = vpack.c.bf16 %v1381_v61, %v1381_v61  ;;  %v620_v1 = vadd.f32 %v619_v27, %v541_v55  ;;  %v1152_v29 = vrot.slane %v3628_v50, 1  ;;  %v2273_v27 = vld [vmem:[%s3989_s6 + $0x8] sm:$0xf]  ;;  %v2374_v55 = vld [vmem:[%s3989_s6 + $0xc] sm:$0xf] }
  0xef   : > { %v622_v17 = vpop.f32.mrf.mxu1  ;;  %v1206_v46 = vsel %vm1189_vm4, %v1203_v59, %v1205_v49  ;;  %v977_v13 = vadd.f32 %v3386_v52, %v956_v58  ;;  %v1802_v19 = vsel %vm779_vm3, %v3580_v60, %v3639_v43  ;;  %v1260_v21 = vsel %vm1243_vm5, %v1257_v24, %v1259_v41 }
  0xf0   : > { %v1237_v9 = vmax.f32 %v1182_v34, %v1206_v46  ;;  %2832 = vmatmul.msk.bf16.gmra.mxu1 %vm477_vm0, %v3643_v12  ;;  %1408 = vst.msk [vmem:[%s3451_s14 + $0x18] sm:$0xf] %vm1401_vm6, %v1394_v62  ;;  %v1460_v38 = vshll.u32 %v3643_v12, 16  ;;  %v2316_v60 = vsel %vm2158_vm7, %v2273_v27, 0  ;;  %v2459_v7 = vsel %vm2158_vm7, %v2374_v55, 0  ;;  %v1353_v55 = vpop.permute.xlu1 %1352 }
  0xf1   : > { %v743_v10 = vpop.f32.mrf.mxu2  ;;  %v994_v42 = vmax.f32 %v977_v13, 0.0  ;;  %2325 = vmatpush.bf16.msra.mxu2 %v2316_v60  ;;  %v1153_v35 = vsel %vm656_vm1, %v1150_v37, %v1152_v29  ;;  %2468 = vmatpush.bf16.msra.mxu3 %v2459_v7  ;;  %v2080_v13 = vld [vmem:[%s3989_s6 + $0x4] sm:$0xf] }
  0xf2   : > { %2854 = vmatmul.msk.bf16.gmra.mxu3 %vm477_vm0, %v1802_v19  ;;  %v1291_v59 = vmax.f32 %v1237_v9, %v1260_v21  ;;  %v771_v24 = vadd.f32 %v743_v10, %v620_v1  ;;  %v3667_v2 = vrot.slane %v1460_v38, 1 }
  0xf3   : > { %v3672_v15 = vmul.f32 %v3365_v8, %v994_v42  ;;  %v1183_v8 = vmax.f32 %v3605_v32, %v1153_v35  ;;  %v2078_v32 = vld [vmem:[%s3989_s6] sm:$0xf] }
  0xf4   : > { %v544_v44 = vpop.f32.mrf.mxu0  ;;  %v1382_v16 = vmul.f32 %v1348_v28, %v1291_v59  ;;  %v929_v20 = vpop.f32.mrf.mxu3  ;;  %v1463_v56 = vsel %vm399_vm2, %v1458_v30, %v3667_v2  ;;  %v2221_v60 = vsel %vm2158_vm7, %v2078_v32, 0 }
  0xf5   : > { %v623_v57 = vadd.f32 %v622_v17, %v544_v44  ;;  %v957_v34 = vadd.f32 %v929_v20, %v771_v24  ;;  %v1207_v62 = vrot.slane %v3672_v15, 2  ;;  %v1261_v46 = vrot.slane %v3672_v15, 3  ;;  %2819 = vmatmul.msk.bf16.gmra.mxu0 %vm477_vm0, %v1463_v56  ;;  %2230 = vmatpush.bf16.msra.mxu1 %v2221_v60 }
  0xf6   : > { %v1395_v58 = vpack.c.bf16 %v1382_v16, %v1382_v16  ;;  %v1154_v37 = vrot.slane %v3672_v15, 1  ;;  %v3684_v1 = vpack.c.bf16 %v3672_v15, %v3628_v50  ;;  %v2160_v44 = vsel %vm2158_vm7, %v2080_v13, 0 }
  0xf7   : > { %v624_v61 = vpop.f32.mrf.mxu1  ;;  %v978_v17 = vadd.f32 %v3386_v52, %v957_v34  ;;  %v1208_v54 = vsel %vm1189_vm4, %v1205_v49, %v1207_v62  ;;  %v1262_v21 = vsel %vm1243_vm5, %v1259_v41, %v1261_v46  ;;  %2169 = vmatpush.bf16.msra.mxu0 %v2160_v44 }
  0xf8   : > { %1409 = vst.msk [vmem:[%s3451_s14 + $0x1c] sm:$0xf] %vm1401_vm6, %v1395_v58  ;;  %v1238_v19 = vmax.f32 %v1183_v8, %v1208_v54  ;;  %v1665_v27 = vrot.slane %v3684_v1, 1  ;;  %v1804_v42 = vshrl.u32 %v3684_v1, 16  ;;  %v1807_v49 = vshll.u32 %v3684_v1, 16 }
  0xf9   : > { %v746_v10 = vpop.f32.mrf.mxu2  ;;  %v995_v38 = vmax.f32 %v978_v17, 0.0  ;;  %v1155_v28 = vsel %vm656_vm1, %v1152_v29, %v1154_v37 }
  0xfa   : > { %v772_v9 = vadd.f32 %v746_v10, %v623_v57  ;;  %v1292_v24 = vmax.f32 %v1238_v19, %v1262_v21  ;;  %v1666_v41 = vsel %vm656_vm1, %v1663_v14, %v1665_v27  ;;  %v1806_v35 = vrot.slane %v1804_v42, 1 }
  0xfb   : > { %v3703_v30 = vmul.f32 %v3331_v48, %v995_v38  ;;  %v1809_v16 = vrot.slane %v1807_v49, 2  ;;  %v1184_v56 = vmax.f32 %v3628_v50, %v1155_v28 }
  0xfc   : > { %v546_v59 = vpop.f32.mrf.mxu0  ;;  %2843 = vmatmul.msk.bf16.gmra.mxu2 %vm477_vm0, %v1666_v41  ;;  %v932_v7 = vpop.f32.mrf.mxu3  ;;  %v1383_v20 = vmul.f32 %v1353_v55, %v1292_v24 }
  0xfd   : > { %v1209_v29 = vrot.slane %v3703_v30, 2  ;;  %v1263_v48 = vrot.slane %v3703_v30, 3  ;;  %v958_v22 = vadd.f32 %v932_v7, %v772_v9  ;;  %v3714_v10 = vor.u32 %v1809_v16, %v1806_v35 }
  0xfe   : > { %v3718_v14 = vpack.c.bf16 %v3703_v30, %v3672_v15  ;;  %v1396_v58 = vpack.c.bf16 %v1383_v20, %v1383_v20  ;;  %v625_v17 = vadd.f32 %v624_v61, %v546_v59  ;;  %v1156_v54 = vrot.slane %v3703_v30, 1  ;;  %v1358_v59 = vpop.permute.xlu2 %1357 }
  0xff   : > { %v627_v57 = vpop.f32.mrf.mxu1  ;;  %v1210_v8 = vsel %vm1189_vm4, %v1207_v62, %v1209_v29  ;;  %v979_v32 = vadd.f32 %v3386_v52, %v958_v22  ;;  %v1811_v50 = vsel %vm779_vm3, %v3639_v43, %v3714_v10  ;;  %v1264_v9 = vsel %vm1243_vm5, %v1261_v46, %v1263_v48 }
 0x100   : > { %v1239_v13 = vmax.f32 %v1184_v56, %v1210_v8  ;;  %2833 = vmatmul.msk.bf16.gmra.mxu1 %vm477_vm0, %v3718_v14  ;;  %1410 = vst.msk [vmem:[%s3451_s14 + $0x20] sm:$0xf] %vm1401_vm6, %v1396_v58  ;;  %v1464_v61 = vshrl.u32 %v3643_v12, 16  ;;  %v1468_v62 = vshll.u32 %v3718_v14, 16  ;;  %v1157_v44 = vsel %vm656_vm1, %v1154_v37, %v1156_v54 }
 0x101   : > { %v748_v34 = vpop.f32.mrf.mxu2  ;;  %v996_v21 = vmax.f32 %v979_v32, 0.0  ;;  %v1185_v37 = vmax.f32 %v3672_v15, %v1157_v44 }
 0x102   : > { %2855 = vmatmul.msk.bf16.gmra.mxu3 %vm477_vm0, %v1811_v50  ;;  %v1293_v19 = vmax.f32 %v1239_v13, %v1264_v9  ;;  %v773_v42 = vadd.f32 %v748_v34, %v625_v17  ;;  %v1466_v43 = vor.u32 %v1464_v61, %v3667_v2  ;;  %v3735_v49 = vrot.slane %v1468_v62, 1  ;;  %v1363_v50 = vpop.permute.xlu0 %1362 }
 0x103   : > { %v3739_v46 = vmul.f32 %v3379_v3, %v996_v21 }
 0x104   : > { %v549_v38 = vpop.f32.mrf.mxu0  ;;  %v1384_v60 = vmul.f32 %v1358_v59, %v1293_v19  ;;  %v934_v55 = vpop.f32.mrf.mxu3  ;;  %v1471_v24 = vsel %vm399_vm2, %v1466_v43, %v3735_v49 }
 0x105   : > { %v959_v28 = vadd.f32 %v934_v55, %v773_v42  ;;  %v1211_v35 = vrot.slane %v3739_v46, 2  ;;  %v1265_v2 = vrot.slane %v3739_v46, 3  ;;  %v628_v16 = vadd.f32 %v627_v57, %v549_v38  ;;  %2820 = vmatmul.msk.bf16.gmra.mxu0 %vm477_vm0, %v1471_v24 }
 0x106   : > { %v1397_v7 = vpack.c.bf16 %v1384_v60, %v1384_v60  ;;  %v1158_v3 = vrot.slane %v3739_v46, 1  ;;  %v3751_v34 = vpack.c.bf16 %v3739_v46, %v3703_v30 }
 0x107   : > { %v629_v12 = vpop.f32.mrf.mxu1  ;;  %v980_v20 = vadd.f32 %v3386_v52, %v959_v28  ;;  %v1212_v56 = vsel %vm1189_vm4, %v1209_v29, %v1211_v35  ;;  %v1266_v8 = vsel %vm1243_vm5, %v1263_v48, %v1265_v2 }
 0x108   : > { %1411 = vst.msk [vmem:[%s3451_s14 + $0x24] sm:$0xf] %vm1401_vm6, %v1397_v7  ;;  %v1240_v22 = vmax.f32 %v1185_v37, %v1212_v56  ;;  %v1667_v57 = vrot.slane %v3751_v34, 1  ;;  %v1813_v13 = vshrl.u32 %v3751_v34, 16  ;;  %v1816_v32 = vshll.u32 %v3751_v34, 16 }
 0x109   : > { %v751_v41 = vpop.f32.mrf.mxu2  ;;  %v997_v58 = vmax.f32 %v980_v20, 0.0  ;;  %v1159_v62 = vsel %vm656_vm1, %v1156_v54, %v1158_v3 }
 0x10a   : > { %v774_v17 = vadd.f32 %v751_v41, %v628_v16  ;;  %v1294_v9 = vmax.f32 %v1240_v22, %v1266_v8  ;;  %v1668_v29 = vsel %vm656_vm1, %v1665_v27, %v1667_v57  ;;  %v1815_v19 = vrot.slane %v1813_v13, 1  ;;  %v1368_v22 = vpop.permute.xlu1 %1367 }
 0x10b   : > { %v1116_v61 = vmul.f32 %v3377_v36, %v997_v58  ;;  %v1818_v21 = vrot.slane %v1816_v32, 2  ;;  %v1186_v36 = vmax.f32 %v3703_v30, %v1159_v62 }
 0x10c   : > { %v551_v15 = vpop.f32.mrf.mxu0  ;;  %2844 = vmatmul.msk.bf16.gmra.mxu2 %vm477_vm0, %v1668_v29  ;;  %v937_v48 = vpop.f32.mrf.mxu3  ;;  %v1385_v59 = vmul.f32 %v1363_v50, %v1294_v9 }
 0x10d   : > { %v1213_v42 = vrot.slane %v1116_v61, 2  ;;  %v1267_v43 = vrot.slane %v1116_v61, 3  ;;  %v960_v54 = vadd.f32 %v937_v48, %v774_v17  ;;  %v3769_v60 = vor.u32 %v1818_v21, %v1815_v19 }
 0x10e   : > { %v3772_v1 = vpack.c.bf16 %v1116_v61, %v3739_v46  ;;  %v1398_v27 = vpack.c.bf16 %v1385_v59, %v1385_v59  ;;  %v630_v28 = vadd.f32 %v629_v12, %v551_v15  ;;  %v1160_v24 = vrot.slane %v1116_v61, 1 }
 0x10f   : > { %v632_v38 = vpop.f32.mrf.mxu1  ;;  %v1214_v55 = vsel %vm1189_vm4, %v1211_v35, %v1213_v42  ;;  %v981_v7 = vadd.f32 %v3386_v52, %v960_v54  ;;  %v1820_v16 = vsel %vm779_vm3, %v3714_v10, %v3769_v60  ;;  %v1268_v30 = vsel %vm1243_vm5, %v1265_v2, %v1267_v43 }
 0x110   : > { %v1241_v41 = vmax.f32 %v1186_v36, %v1214_v55  ;;  %2834 = vmatmul.msk.bf16.gmra.mxu1 %vm477_vm0, %v3772_v1  ;;  %1412 = vst.msk [vmem:[%s3451_s14 + $0x28] sm:$0xf] %vm1401_vm6, %v1398_v27  ;;  %v1472_v35 = vshrl.u32 %v3718_v14, 16  ;;  %v1476_v12 = vshll.u32 %v3772_v1, 16  ;;  %v1161_v17 = vsel %vm656_vm1, %v1158_v3, %v1160_v24 }
 0x111   : > { %v753_v44 = vpop.f32.mrf.mxu2  ;;  %v998_v20 = vmax.f32 %v981_v7, 0.0  ;;  %v1373_v7 = vpop.permute.xlu2 %1372  ;;  %v1480_v34 = vshrl.u32 %v3772_v1, 16 }
 0x112   : > { %2856 = vmatmul.msk.bf16.gmra.mxu3 %vm477_vm0, %v1820_v16  ;;  %v1295_v37 = vmax.f32 %v1241_v41, %v1268_v30  ;;  %v775_v58 = vadd.f32 %v753_v44, %v630_v28  ;;  %v1474_v10 = vor.u32 %v1472_v35, %v3735_v49  ;;  %v1478_v8 = vrot.slane %v1476_v12, 1 }
 0x113   : > { %v1117_v2 = vmul.f32 %v3344_v4, %v998_v20  ;;  %v1187_v49 = vmax.f32 %v3739_v46, %v1161_v17 }
 0x114   : > { %v554_v56 = vpop.f32.mrf.mxu0  ;;  %v1386_v15 = vmul.f32 %v1368_v22, %v1295_v37  ;;  %v939_v32 = vpop.f32.mrf.mxu3  ;;  %v1479_v9 = vsel %vm399_vm2, %v1474_v10, %v1478_v8  ;;  %v1482_v10 = vor.u32 %v1480_v34, %v1478_v8 }
 0x115   : > { %v633_v13 = vadd.f32 %v632_v38, %v554_v56  ;;  %v961_v14 = vadd.f32 %v939_v32, %v775_v58  ;;  %v1215_v48 = vrot.slane %v1117_v2, 2  ;;  %v1269_v19 = vrot.slane %v1117_v2, 3  ;;  %2821 = vmatmul.msk.bf16.gmra.mxu0 %vm477_vm0, %v1479_v9 }
 0x116   : > { %v1399_v29 = vpack.c.bf16 %v1386_v15, %v1386_v15  ;;  %v1646_v21 = vpack.c.bf16 %v1117_v2, %v1116_v61  ;;  %v1422_v20 = vpack.c.bf16 %v1117_v2, %v1117_v2 }
 0x117   : > { %v634_v50 = vpop.f32.mrf.mxu1  ;;  %v982_v3 = vadd.f32 %v3386_v52, %v961_v14  ;;  %v1216_v4 = vsel %vm1189_vm4, %v1213_v42, %v1215_v48  ;;  %v1270_v27 = vsel %vm1243_vm5, %v1267_v43, %v1269_v19 }
 0x118   : > { %1413 = vst.msk [vmem:[%s3451_s14 + $0x2c] sm:$0xf] %vm1401_vm6, %v1399_v29  ;;  %v1242_v59 = vmax.f32 %v1187_v49, %v1216_v4  ;;  %v1669_v36 = vrot.slane %v1646_v21, 1  ;;  %v1822_v54 = vshrl.u32 %v1646_v21, 16  ;;  %v1825_v28 = vshll.u32 %v1646_v21, 16 }
 0x119   : > { %v756_v62 = vpop.f32.mrf.mxu2  ;;  %v999_v44 = vmax.f32 %v982_v3, 0.0 }
 0x11a   : > { %v776_v38 = vadd.f32 %v756_v62, %v633_v13  ;;  %v1296_v24 = vmax.f32 %v1242_v59, %v1270_v27  ;;  %v1670_v46 = vsel %vm656_vm1, %v1667_v57, %v1669_v36  ;;  %v1824_v61 = vrot.slane %v1822_v54, 1 }
 0x11b   : > { %v1118_v41 = vmul.f32 %v3392_v25, %v999_v44  ;;  %v1827_v16 = vrot.slane %v1825_v28, 2  ;;  %v3824_v28 = vld [vmem:[%s3988_s5] ss:$0 sm:$0xff] }
 0x11c   : > { %v556_v55 = vpop.f32.mrf.mxu0  ;;  %2845 = vmatmul.msk.bf16.gmra.mxu2 %vm477_vm0, %v1670_v46  ;;  %v942_v42 = vpop.f32.mrf.mxu3  ;;  %v1387_v30 = vmul.f32 %v1373_v7, %v1296_v24 }
 0x11d   : > { %v1425_v35 = vpack.c.bf16 %v1118_v41, %v1117_v2  ;;  %v962_v12 = vadd.f32 %v942_v42, %v776_v38  ;;  %v1828_v37 = vor.u32 %v1827_v16, %v1824_v61 }
 0x11e   : > { %v1400_v56 = vpack.c.bf16 %v1387_v30, %v1387_v30 }
 0x11f   : > { %v983_v25 = vadd.f32 %v3386_v52, %v962_v12  ;;  %v1484_v22 = vshll.u32 %v1425_v35, 16  ;;  %v1829_v57 = vsel %vm779_vm3, %v3769_v60, %v1828_v37 }
 0x120   : > { %2835 = vmatmul.msk.bf16.gmra.mxu1 %vm477_vm0, %v1422_v20  ;;  %1414 = vst.msk [vmem:[%s3451_s14 + $0x30] sm:$0xf] %vm1401_vm6, %v1400_v56 }
 0x121   : > { %v758_v43 = vpop.f32.mrf.mxu2  ;;  %v1000_v58 = vmax.f32 %v983_v25, 0.0  ;;  %v1486_v17 = vrot.slane %v1484_v22, 1 }
 0x122   : > { %2857 = vmatmul.msk.bf16.gmra.mxu3 %vm477_vm0, %v1829_v57 }
 0x123   : > { %v1119_v15 = vmul.f32 %v3389_v53, %v1000_v58  ;;  %v1487_v2 = vsel %vm399_vm2, %v1482_v10, %v1486_v17  ;;  %v1488_v53 = vshrl.u32 %v1425_v35, 16 }
 0x124   : > { %v944_v52 = vpop.f32.mrf.mxu3 }
 0x125   : > { %v1647_v13 = vpack.c.bf16 %v1119_v15, %v1118_v41  ;;  %2822 = vmatmul.msk.bf16.gmra.mxu0 %vm477_vm0, %v1487_v2  ;;  %v1490_v48 = vor.u32 %v1488_v53, %v1486_v17 }
 0x127   : > { %v1671_v1 = vrot.slane %v1647_v13, 1  ;;  %v1831_v32 = vshrl.u32 %v1647_v13, 16  ;;  %v1834_v60 = vshll.u32 %v1647_v13, 16 }
 0x129   : > { %v1672_v50 = vsel %vm656_vm1, %v1669_v36, %v1671_v1  ;;  %v1833_v14 = vrot.slane %v1831_v32, 1  ;;  %v1836_v9 = vrot.slane %v1834_v60, 2 }
 0x12b   : > { %v1837_v62 = vor.u32 %v1836_v9, %v1833_v14  ;;  %v1601_v8 = vpop.f32.mrf.mxu1 }
 0x12c   : > { %2846 = vmatmul.msk.bf16.gmra.mxu2 %vm477_vm0, %v1672_v50 }
 0x12d   : > { %v1838_v29 = vsel %vm779_vm3, %v1828_v37, %v1837_v62 }
 0x132   : > { %2858 = vmatmul.msk.bf16.gmra.mxu3 %vm477_vm0, %v1838_v29 }
 0x133   : > { %v1603_v19 = vpop.f32.mrf.mxu1 }
 0x135   : > { %2823 = vmatmul.msk.bf16.gmra.mxu0 %vm477_vm0, %v1490_v48 }
 0x13b   : > { %v1606_v49 = vpop.f32.mrf.mxu1 }
 0x13c   : > { %2847 = vmatmul.msk.bf16.gmra.mxu2 %vm477_vm0, %v1671_v1 }
 0x140   : > { %v1530_v3 = vpop.f32.mrf.mxu0 }
 0x141   : > { %v1602_v44 = vadd.f32 %v1601_v8, %v1530_v3 }
 0x142   : > { %2859 = vmatmul.msk.bf16.gmra.mxu3 %vm477_vm0, %v1837_v62 }
 0x143   : > { %v1608_v21 = vpop.f32.mrf.mxu1 }
 0x148   : > { %v1532_v4 = vpop.f32.mrf.mxu0 }
 0x149   : > { %v1604_v46 = vadd.f32 %v1603_v19, %v1532_v4 }
 0x14b   : > { %v1611_v38 = vpop.f32.mrf.mxu1 }
 0x14c   : > { %v1712_v59 = vpop.f32.mrf.mxu2 }
 0x14d   : > { %v1751_v27 = vadd.f32 %v1712_v59, %v1602_v44 }
 0x150   : > { %v1535_v36 = vpop.f32.mrf.mxu0  ;;  %v1878_v54 = vpop.f32.mrf.mxu3 }
 0x151   : > { %v1917_v55 = vadd.f32 %v1878_v54, %v1751_v27  ;;  %v1607_v34 = vadd.f32 %v1606_v49, %v1535_v36 }
 0x153   : > { %v1613_v24 = vpop.f32.mrf.mxu1  ;;  %v1936_v61 = vadd.f32 %v3824_v28, %v1917_v55 }
 0x154   : > { %v1714_v41 = vpop.f32.mrf.mxu2 }
 0x155   : > { %v1752_v7 = vadd.f32 %v1714_v41, %v1604_v46  ;;  %v1951_v35 = vmax.f32 %v1936_v61, 0.0 }
 0x157   : > { %v2056_v56 = vmul.f32 %v3419_v0, %v1951_v35 }
 0x158   : > { %v1537_v42 = vpop.f32.mrf.mxu0  ;;  %v1880_v16 = vpop.f32.mrf.mxu3 }
 0x159   : > { %v1918_v30 = vadd.f32 %v1880_v16, %v1752_v7  ;;  %v1609_v52 = vadd.f32 %v1608_v21, %v1537_v42 }
 0x15b   : > { %v1937_v12 = vadd.f32 %v3824_v28, %v1918_v30 }
 0x15d   : > { %v3828_v43 = vpop.f32.mrf.mxu1  ;;  %v1952_v20 = vmax.f32 %v1937_v12, 0.0 }
 0x15f   : > { %v1717_v37 = vpop.f32.mrf.mxu2  ;;  %v2057_v25 = vmul.f32 %v3358_v6, %v1952_v20 }
 0x160   : > { %v1753_v58 = vadd.f32 %v1717_v37, %v1607_v34 }
 0x161   : > { %v2071_v22 = vpack.c.bf16 %v2057_v25, %v2056_v56 }
 0x162   : > { %v1540_v57 = vpop.f32.mrf.mxu0 }
 0x163   : > { %2867 = vmatmul.msk.bf16.vlgmr.msra.gmra.mxu1 %vm2136_vm8, %v2071_v22  ;;  %v2084_v62 = vshll.u32 %v2071_v22, 16  ;;  %v1612_v8 = vadd.f32 %v1611_v38, %v1540_v57  ;;  %v2082_v54 = vshrl.u32 %v2071_v22, 16 }
 0x165   : > { %v1883_v10 = vpop.f32.mrf.mxu3  ;;  %v3833_v17 = vpop.f32.mrf.mxu1  ;;  %v2086_v21 = vrot.slane %v2084_v62, 1 }
 0x166   : > { %v1919_v2 = vadd.f32 %v1883_v10, %v1753_v58 }
 0x167   : > { %v1719_v15 = vpop.f32.mrf.mxu2 }
 0x168   : > { %v1938_v13 = vadd.f32 %v3824_v28, %v1919_v2  ;;  %v1754_v1 = vadd.f32 %v1719_v15, %v1609_v52 }
 0x16a   : > { %v1542_v32 = vpop.f32.mrf.mxu0  ;;  %v1953_v50 = vmax.f32 %v1938_v13, 0.0 }
 0x16b   : > { %v1614_v41 = vadd.f32 %v1613_v24, %v1542_v32 }
 0x16c   : > { %v2058_v53 = vmul.f32 %v3403_v45, %v1953_v50 }
 0x16d   : > { %v1885_v0 = vpop.f32.mrf.mxu3  ;;  %v3836_v6 = vpop.f32.mrf.mxu1 }
 0x16e   : > { %v1920_v60 = vadd.f32 %v1885_v0, %v1754_v1  ;;  %v2266_v36 = vpack.c.bf16 %v2058_v53, %v2057_v25 }
 0x16f   : > { %v1722_v9 = vpop.f32.mrf.mxu2 }
 0x170   : > { %v1939_v14 = vadd.f32 %v3824_v28, %v1920_v60  ;;  %v1755_v19 = vadd.f32 %v1722_v9, %v1612_v8  ;;  %v2376_v61 = vshrl.u32 %v2266_v36, 16  ;;  %v2379_v7 = vshll.u32 %v2266_v36, 16 }
 0x171   : > { %v2281_v25 = vrot.slane %v2266_v36, 1 }
 0x172   : > { %v1954_v29 = vmax.f32 %v1939_v14, 0.0  ;;  %v1545_v49 = vpop.f32.mrf.mxu0  ;;  %v2378_v24 = vrot.slane %v2376_v61, 1  ;;  %v2381_v34 = vrot.slane %v2379_v7, 2 }
 0x173   : > { %v1617_v15 = vadd.f32 %v3828_v43, %v1545_v49 }
 0x174   : > { %v2059_v48 = vmul.f32 %v3397_v40, %v1954_v29  ;;  %v2087_v40 = vor.u32 %v2086_v21, %v2082_v54  ;;  %v2382_v50 = vor.u32 %v2381_v34, %v2378_v24 }
 0x175   : > { %v1888_v3 = vpop.f32.mrf.mxu3  ;;  %v3841_v59 = vpop.f32.mrf.mxu1 }
 0x176   : > { %v1921_v4 = vadd.f32 %v1888_v3, %v1755_v19  ;;  %v2072_v44 = vpack.c.bf16 %v2059_v48, %v2058_v53 }
 0x177   : > { %v1724_v38 = vpop.f32.mrf.mxu2 }
 0x178   : > { %v1940_v27 = vadd.f32 %v3824_v28, %v1921_v4  ;;  %v2089_v55 = vshll.u32 %v2072_v44, 16  ;;  %2868 = vmatmul.msk.bf16.gmra.mxu1 %vm2136_vm8, %v2072_v44  ;;  %v1756_v16 = vadd.f32 %v1724_v38, %v1614_v41  ;;  %v2093_v19 = vshrl.u32 %v2072_v44, 16 }
 0x17a   : > { %v1955_v45 = vmax.f32 %v1940_v27, 0.0  ;;  %v2091_v46 = vrot.slane %v2089_v55, 1  ;;  %v1547_v30 = vpop.f32.mrf.mxu0 }
 0x17b   : > { %v1619_v49 = vadd.f32 %v3833_v17, %v1547_v30 }
 0x17c   : > { %v2060_v42 = vmul.f32 %v3370_v11, %v1955_v45  ;;  %v2092_v35 = vsel %vm399_vm2, %v2087_v40, %v2091_v46  ;;  %v2095_v21 = vor.u32 %v2093_v19, %v2091_v46 }
 0x17d   : > { %v1890_v12 = vpop.f32.mrf.mxu3  ;;  %2860 = vmatmul.msk.bf16.vlgmr.msra.gmra.mxu0 %vm2136_vm8, %v2092_v35  ;;  %v3848_v56 = vpop.f32.mrf.mxu1 }
 0x17e   : > { %v2267_v37 = vpack.c.bf16 %v2060_v42, %v2059_v48  ;;  %v1922_v20 = vadd.f32 %v1890_v12, %v1756_v16 }
 0x17f   : > { %v1727_v11 = vpop.f32.mrf.mxu2 }
 0x180   : > { %v2282_v22 = vrot.slane %v2267_v37, 1  ;;  %v2384_v57 = vshrl.u32 %v2267_v37, 16  ;;  %v2387_v58 = vshll.u32 %v2267_v37, 16  ;;  %v1941_v10 = vadd.f32 %v3824_v28, %v1922_v20 }
 0x181   : > { %v1757_v0 = vadd.f32 %v1727_v11, %v1617_v15 }
 0x182   : > { %v2386_v2 = vrot.slane %v2384_v57, 1  ;;  %v2389_v52 = vrot.slane %v2387_v58, 2  ;;  %v1956_v13 = vmax.f32 %v1941_v10, 0.0  ;;  %v2283_v1 = vsel %vm656_vm1, %v2281_v25, %v2282_v22  ;;  %v1550_v60 = vpop.f32.mrf.mxu0 }
 0x183   : > { %2874 = vmatmul.msk.bf16.vlgmr.msra.gmra.mxu2 %vm2136_vm8, %v2283_v1 }
 0x184   : > { %v2061_v32 = vmul.f32 %v3414_v5, %v1956_v13  ;;  %v2390_v14 = vor.u32 %v2389_v52, %v2386_v2 }
 0x185   : > { %v1893_v9 = vpop.f32.mrf.mxu3  ;;  %v3856_v29 = vpop.f32.mrf.mxu1 }
 0x186   : > { %v1923_v62 = vadd.f32 %v1893_v9, %v1757_v0  ;;  %v2391_v8 = vsel %vm779_vm3, %v2382_v50, %v2390_v14  ;;  %v2073_v43 = vpack.c.bf16 %v2061_v32, %v2060_v42  ;;  %v1622_v42 = vadd.f32 %v3836_v6, %v1550_v60 }
 0x187   : > { %2881 = vmatmul.msk.bf16.vlgmr.msra.gmra.mxu3 %vm2136_vm8, %v2391_v8  ;;  %v1729_v48 = vpop.f32.mrf.mxu2 }
 0x188   : > { %v1942_v53 = vadd.f32 %v3824_v28, %v1923_v62  ;;  %2869 = vmatmul.msk.bf16.gmra.mxu1 %vm2136_vm8, %v2073_v43  ;;  %v2097_v5 = vshll.u32 %v2073_v43, 16  ;;  %v1758_v54 = vadd.f32 %v1729_v48, %v1619_v49  ;;  %v2101_v11 = vshrl.u32 %v2073_v43, 16 }
 0x18a   : > { %v1957_v3 = vmax.f32 %v1942_v53, 0.0  ;;  %v2099_v4 = vrot.slane %v2097_v5, 1  ;;  %v1552_v27 = vpop.f32.mrf.mxu0 }
 0x18c   : > { %v2062_v36 = vmul.f32 %v3381_v18, %v1957_v3  ;;  %v2100_v55 = vsel %vm399_vm2, %v2095_v21, %v2099_v4  ;;  %v2103_v52 = vor.u32 %v2101_v11, %v2099_v4 }
 0x18d   : > { %v1895_v38 = vpop.f32.mrf.mxu3  ;;  %2861 = vmatmul.msk.bf16.gmra.mxu0 %vm2136_vm8, %v2100_v55  ;;  %v3865_v40 = vpop.f32.mrf.mxu1 }
 0x18e   : > { %v2268_v41 = vpack.c.bf16 %v2062_v36, %v2061_v32  ;;  %v1924_v45 = vadd.f32 %v1895_v38, %v1758_v54 }
 0x18f   : > { %v1732_v61 = vpop.f32.mrf.mxu2 }
 0x190   : > { %v1943_v44 = vadd.f32 %v3824_v28, %v1924_v45  ;;  %v2284_v17 = vrot.slane %v2268_v41, 1  ;;  %v2393_v7 = vshrl.u32 %v2268_v41, 16  ;;  %v2396_v46 = vshll.u32 %v2268_v41, 16 }
 0x191   : > { %v1759_v37 = vadd.f32 %v1732_v61, %v1622_v42 }
 0x192   : > { %v1958_v18 = vmax.f32 %v1943_v44, 0.0  ;;  %v2285_v16 = vsel %vm656_vm1, %v2282_v22, %v2284_v17  ;;  %v2395_v30 = vrot.slane %v2393_v7, 1  ;;  %v2398_v35 = vrot.slane %v2396_v46, 2  ;;  %v1555_v20 = vpop.f32.mrf.mxu0 }
 0x193   : > { %2875 = vmatmul.msk.bf16.gmra.mxu2 %vm2136_vm8, %v2285_v16  ;;  %v1627_v19 = vadd.f32 %v3848_v56, %v1555_v20 }
 0x194   : > { %v2063_v12 = vmul.f32 %v3442_v63, %v1958_v18  ;;  %v2399_v25 = vor.u32 %v2398_v35, %v2395_v30  ;;  %v1624_v63 = vadd.f32 %v3841_v59, %v1552_v27 }
 0x195   : > { %v1898_v24 = vpop.f32.mrf.mxu3  ;;  %v3873_v10 = vpop.f32.mrf.mxu1 }
 0x196   : > { %v2074_v34 = vpack.c.bf16 %v2063_v12, %v2062_v36  ;;  %v1925_v57 = vadd.f32 %v1898_v24, %v1759_v37  ;;  %v2400_v58 = vsel %vm779_vm3, %v2390_v14, %v2399_v25 }
 0x197   : > { %2882 = vmatmul.msk.bf16.gmra.mxu3 %vm2136_vm8, %v2400_v58  ;;  %v1734_v22 = vpop.f32.mrf.mxu2 }
 0x198   : > { %v1944_v6 = vadd.f32 %v3824_v28, %v1925_v57  ;;  %2870 = vmatmul.msk.bf16.gmra.mxu1 %vm2136_vm8, %v2074_v34  ;;  %v2105_v15 = vshll.u32 %v2074_v34, 16  ;;  %v1760_v32 = vadd.f32 %v1734_v22, %v1624_v63  ;;  %v2109_v61 = vshrl.u32 %v2074_v34, 16 }
 0x19a   : > { %v1959_v2 = vmax.f32 %v1944_v6, 0.0  ;;  %v2107_v13 = vrot.slane %v2105_v15, 1  ;;  %v1557_v0 = vpop.f32.mrf.mxu0 }
 0x19c   : > { %v2064_v1 = vmul.f32 %v3437_v31, %v1959_v2  ;;  %v2108_v60 = vsel %vm399_vm2, %v2103_v52, %v2107_v13  ;;  %v2111_v46 = vor.u32 %v2109_v61, %v2107_v13 }
 0x19d   : > { %v1900_v50 = vpop.f32.mrf.mxu3  ;;  %2862 = vmatmul.msk.bf16.gmra.mxu0 %vm2136_vm8, %v2108_v60  ;;  %v3882_v62 = vpop.f32.mrf.mxu1 }
 0x19e   : > { %v2269_v14 = vpack.c.bf16 %v2064_v1, %v2063_v12  ;;  %v1926_v9 = vadd.f32 %v1900_v50, %v1760_v32 }
 0x19f   : > { %v1737_v43 = vpop.f32.mrf.mxu2 }
 0x1a0   : > { %v1945_v8 = vadd.f32 %v3824_v28, %v1926_v9  ;;  %v2286_v59 = vrot.slane %v2269_v14, 1  ;;  %v2402_v53 = vshrl.u32 %v2269_v14, 16  ;;  %v2405_v48 = vshll.u32 %v2269_v14, 16 }
 0x1a1   : > { %v1761_v4 = vadd.f32 %v1737_v43, %v1627_v19 }
 0x1a2   : > { %v1960_v31 = vmax.f32 %v1945_v8, 0.0  ;;  %v2287_v5 = vsel %vm656_vm1, %v2284_v17, %v2286_v59  ;;  %v2404_v49 = vrot.slane %v2402_v53, 1  ;;  %v2407_v3 = vrot.slane %v2405_v48, 2  ;;  %v1560_v36 = vpop.f32.mrf.mxu0 }
 0x1a3   : > { %2876 = vmatmul.msk.bf16.gmra.mxu2 %vm2136_vm8, %v2287_v5  ;;  %v1632_v58 = vadd.f32 %v3865_v40, %v1560_v36 }
 0x1a4   : > { %v2065_v21 = vmul.f32 %v3394_v33, %v1960_v31  ;;  %v2408_v54 = vor.u32 %v2407_v3, %v2404_v49  ;;  %v1629_v33 = vadd.f32 %v3856_v29, %v1557_v0 }
 0x1a5   : > { %v1903_v27 = vpop.f32.mrf.mxu3  ;;  %v1638_v45 = vpop.f32.mrf.mxu1 }
 0x1a6   : > { %v2075_v55 = vpack.c.bf16 %v2065_v21, %v2064_v1  ;;  %v1927_v38 = vadd.f32 %v1903_v27, %v1761_v4  ;;  %v2409_v41 = vsel %vm779_vm3, %v2399_v25, %v2408_v54 }
 0x1a7   : > { %2883 = vmatmul.msk.bf16.gmra.mxu3 %vm2136_vm8, %v2409_v41  ;;  %v1739_v44 = vpop.f32.mrf.mxu2 }
 0x1a8   : > { %v1946_v56 = vadd.f32 %v3824_v28, %v1927_v38  ;;  %2871 = vmatmul.msk.bf16.gmra.mxu1 %vm2136_vm8, %v2075_v55  ;;  %v2113_v17 = vshll.u32 %v2075_v55, 16  ;;  %v1762_v16 = vadd.f32 %v1739_v44, %v1629_v33  ;;  %v2117_v50 = vshrl.u32 %v2075_v55, 16 }
 0x1aa   : > { %v1961_v7 = vmax.f32 %v1946_v56, 0.0  ;;  %v2115_v42 = vrot.slane %v2113_v17, 1  ;;  %v1562_v30 = vpop.f32.mrf.mxu0 }
 0x1ab   : > { %v1634_v9 = vadd.f32 %v3873_v10, %v1562_v30 }
 0x1ac   : > { %v2066_v18 = vmul.f32 %v3473_v23, %v1961_v7  ;;  %v2116_v35 = vsel %vm399_vm2, %v2111_v46, %v2115_v42  ;;  %v2119_v8 = vor.u32 %v2117_v50, %v2115_v42 }
 0x1ad   : > { %v1905_v12 = vpop.f32.mrf.mxu3  ;;  %2863 = vmatmul.msk.bf16.gmra.mxu0 %vm2136_vm8, %v2116_v35 }
 0x1ae   : > { %v2270_v37 = vpack.c.bf16 %v2066_v18, %v2065_v21  ;;  %v1928_v20 = vadd.f32 %v1905_v12, %v1762_v16 }
 0x1af   : > { %v1742_v24 = vpop.f32.mrf.mxu2 }
 0x1b0   : > { %v1947_v25 = vadd.f32 %v3824_v28, %v1928_v20  ;;  %v2288_v34 = vrot.slane %v2270_v37, 1  ;;  %v2411_v57 = vshrl.u32 %v2270_v37, 16  ;;  %v2414_v29 = vshll.u32 %v2270_v37, 16 }
 0x1b1   : > { %v1763_v63 = vadd.f32 %v1742_v24, %v1632_v58 }
 0x1b2   : > { %v1962_v6 = vmax.f32 %v1947_v25, 0.0  ;;  %v2289_v23 = vsel %vm656_vm1, %v2286_v59, %v2288_v34  ;;  %v2413_v22 = vrot.slane %v2411_v57, 1  ;;  %v2416_v11 = vrot.slane %v2414_v29, 2  ;;  %v1565_v2 = vpop.f32.mrf.mxu0 }
 0x1b3   : > { %2877 = vmatmul.msk.bf16.gmra.mxu2 %vm2136_vm8, %v2289_v23 }
 0x1b4   : > { %v2067_v15 = vmul.f32 %v3468_v51, %v1962_v6  ;;  %v2417_v52 = vor.u32 %v2416_v11, %v2413_v22 }
 0x1b5   : > { %v1908_v13 = vpop.f32.mrf.mxu3 }
 0x1b6   : > { %v2076_v1 = vpack.c.bf16 %v2067_v15, %v2066_v18  ;;  %v1929_v32 = vadd.f32 %v1908_v13, %v1763_v63  ;;  %v2418_v0 = vsel %vm779_vm3, %v2408_v54, %v2417_v52  ;;  %v1637_v54 = vadd.f32 %v3882_v62, %v1565_v2 }
 0x1b7   : > { %2884 = vmatmul.msk.bf16.gmra.mxu3 %vm2136_vm8, %v2418_v0  ;;  %v1744_v60 = vpop.f32.mrf.mxu2 }
 0x1b8   : > { %v1948_v40 = vadd.f32 %v3824_v28, %v1929_v32  ;;  %2872 = vmatmul.msk.bf16.gmra.mxu1 %vm2136_vm8, %v2076_v1  ;;  %v2121_v14 = vshll.u32 %v2076_v1, 16  ;;  %v1764_v53 = vadd.f32 %v1744_v60, %v1634_v9  ;;  %v2125_v42 = vshrl.u32 %v2076_v1, 16 }
 0x1ba   : > { %v1963_v51 = vmax.f32 %v1948_v40, 0.0  ;;  %v2123_v43 = vrot.slane %v2121_v14, 1  ;;  %v1567_v48 = vpop.f32.mrf.mxu0  ;;  %v3932_v40 = vld [vmem:[%s3990_s7] ss:$0 sm:$0xff] }
 0x1bc   : > { %v2068_v59 = vmul.f32 %v3412_v47, %v1963_v51  ;;  %v2124_v19 = vsel %vm399_vm2, %v2119_v8, %v2123_v43  ;;  %v2127_v30 = vor.u32 %v2125_v42, %v2123_v43 }
 0x1bd   : > { %v1910_v31 = vpop.f32.mrf.mxu3  ;;  %2864 = vmatmul.msk.bf16.gmra.mxu0 %vm2136_vm8, %v2124_v19 }
 0x1be   : > { %v2271_v5 = vpack.c.bf16 %v2068_v59, %v2067_v15  ;;  %v1930_v49 = vadd.f32 %v1910_v31, %v1764_v53  ;;  %v2077_v7 = vpack.c.bf16 %v2068_v59, %v2068_v59  ;;  %v2563_v53 = vpop.permute.xlu0 %2562 }
 0x1bf   : > { %v1747_v21 = vpop.f32.mrf.mxu2 }
 0x1c0   : > { %v1949_v3 = vadd.f32 %v3824_v28, %v1930_v49  ;;  %v2290_v4 = vrot.slane %v2271_v5, 1  ;;  %v2420_v36 = vshrl.u32 %v2271_v5, 16  ;;  %v2423_v10 = vshll.u32 %v2271_v5, 16 }
 0x1c1   : > { %v1765_v45 = vadd.f32 %v1747_v21, %v1637_v54 }
 0x1c2   : > { %v1964_v27 = vmax.f32 %v1949_v3, 0.0  ;;  %v2291_v47 = vsel %vm656_vm1, %v2288_v34, %v2290_v4  ;;  %v2422_v55 = vrot.slane %v2420_v36, 1  ;;  %v2425_v38 = vrot.slane %v2423_v10, 2 }
 0x1c3   : > { %2878 = vmatmul.msk.bf16.gmra.mxu2 %vm2136_vm8, %v2291_v47 }
 0x1c4   : > { %v2069_v41 = vmul.f32 %v3509_v39, %v1964_v27  ;;  %v2426_v56 = vor.u32 %v2425_v38, %v2422_v55  ;;  %v2568_v27 = vpop.permute.xlu1 %2567 }
 0x1c5   : > { %v1913_v44 = vpop.f32.mrf.mxu3 }
 0x1c6   : > { %v2079_v61 = vpack.c.bf16 %v2069_v41, %v2068_v59  ;;  %v1931_v17 = vadd.f32 %v1913_v44, %v1765_v45  ;;  %v2427_v33 = vsel %vm779_vm3, %v2417_v52, %v2426_v56 }
 0x1c7   : > { %2885 = vmatmul.msk.bf16.gmra.mxu3 %vm2136_vm8, %v2427_v33  ;;  %v1749_v46 = vpop.f32.mrf.mxu2 }
 0x1c8   : > { %v1950_v62 = vadd.f32 %v3824_v28, %v1931_v17  ;;  %2873 = vmatmul.msk.bf16.gmra.mxu1 %vm2136_vm8, %v2077_v7  ;;  %v2129_v18 = vshll.u32 %v2079_v61, 16 }
 0x1ca   : > { %v1965_v16 = vmax.f32 %v1950_v62, 0.0  ;;  %v2131_v39 = vrot.slane %v2129_v18, 1  ;;  %v2573_v62 = vpop.permute.xlu2 %2572 }
 0x1cc   : > { %v2070_v35 = vmul.f32 %v3503_v26, %v1965_v16  ;;  %v2132_v12 = vsel %vm399_vm2, %v2127_v30, %v2131_v39  ;;  %v2133_v26 = vshrl.u32 %v2079_v61, 16 }
 0x1cd   : > { %v1915_v37 = vpop.f32.mrf.mxu3  ;;  %2865 = vmatmul.msk.bf16.gmra.mxu0 %vm2136_vm8, %v2132_v12 }
 0x1ce   : > { %v2272_v20 = vpack.c.bf16 %v2070_v35, %v2069_v41  ;;  %v2135_v23 = vor.u32 %v2133_v26, %v2131_v39 }
 0x1d0   : > { %v2292_v25 = vrot.slane %v2272_v20, 1  ;;  %v2429_v24 = vshrl.u32 %v2272_v20, 16  ;;  %v2432_v34 = vshll.u32 %v2272_v20, 16 }
 0x1d2   : > { %v2293_v28 = vsel %vm656_vm1, %v2290_v4, %v2292_v25  ;;  %v2431_v57 = vrot.slane %v2429_v24, 1  ;;  %v2434_v29 = vrot.slane %v2432_v34, 2  ;;  %v2578_v24 = vpop.permute.xlu0 %2577 }
 0x1d3   : > { %2879 = vmatmul.msk.bf16.gmra.mxu2 %vm2136_vm8, %v2293_v28 }
 0x1d4   : > { %v2435_v58 = vor.u32 %v2434_v29, %v2431_v57 }
 0x1d6   : > { %v2436_v6 = vsel %vm779_vm3, %v2426_v56, %v2435_v58 }
 0x1d7   : > { %2886 = vmatmul.msk.bf16.gmra.mxu3 %vm2136_vm8, %v2436_v6 }
 0x1dd   : > { %2866 = vmatmul.msk.bf16.gmra.mxu0 %vm2136_vm8, %v2135_v23 }
 0x1e0   : > { %v2232_v22 = vpop.f32.mrf.mxu1 }
 0x1e3   : > { %2880 = vmatmul.msk.bf16.gmra.mxu2 %vm2136_vm8, %v2292_v25 }
 0x1e7   : > { %2887 = vmatmul.msk.bf16.gmra.mxu3 %vm2136_vm8, %v2435_v58 }
 0x1e8   : > { %v2234_v11 = vpop.f32.mrf.mxu1 }
 0x1f5   : > { %v2237_v15 = vpop.f32.mrf.mxu1 }
 0x1fa   : > { %v2171_v63 = vpop.f32.mrf.mxu0 }
 0x1fb   : > { %v2233_v32 = vadd.f32 %v2232_v22, %v2171_v63  ;;  %v2583_v63 = vpop.permute.xlu1 %2582 }
 0x1fd   : > { %v2239_v2 = vpop.f32.mrf.mxu1 }
 0x202   : > { %v2173_v52 = vpop.f32.mrf.mxu0 }
 0x203   : > { %v2235_v43 = vadd.f32 %v2234_v11, %v2173_v52 }
 0x205   : > { %v2242_v13 = vpop.f32.mrf.mxu1 }
 0x206   : > { %v2327_v1 = vpop.f32.mrf.mxu2 }
 0x207   : > { %v2361_v0 = vadd.f32 %v2327_v1, %v2233_v32 }
 0x20a   : > { %v2176_v60 = vpop.f32.mrf.mxu0  ;;  %v2470_v50 = vpop.f32.mrf.mxu3 }
 0x20b   : > { %v2504_v14 = vadd.f32 %v2470_v50, %v2361_v0  ;;  %v2238_v10 = vadd.f32 %v2237_v15, %v2176_v60 }
 0x20d   : > { %v2521_v9 = vadd.f32 %v3932_v40, %v2504_v14  ;;  %v2244_v51 = vpop.f32.mrf.mxu1 }
 0x20e   : > { %v2329_v8 = vpop.f32.mrf.mxu2 }
 0x20f   : > { %v2534_v59 = vmax.f32 %v2521_v9, 0.0  ;;  %v2362_v19 = vadd.f32 %v2329_v8, %v2235_v43  ;;  %v2588_v43 = vpop.permute.xlu2 %2587 }
 0x211   : > { %v2625_v48 = vmul.f32 %v2563_v53, %v2534_v59 }
 0x212   : > { %v2178_v31 = vpop.f32.mrf.mxu0  ;;  %v2472_v5 = vpop.f32.mrf.mxu3 }
 0x213   : > { %v2638_v49 = vpack.c.bf16 %v2625_v48, %v2625_v48  ;;  %v2505_v3 = vadd.f32 %v2472_v5, %v2362_v19  ;;  %v2240_v33 = vadd.f32 %v2239_v2, %v2178_v31 }
 0x215   : > { %2651 = vst.msk [vmem:[%s3940_s28] sm:$0xf] %vm1401_vm6, %v2638_v49  ;;  %v2522_v21 = vadd.f32 %v3932_v40, %v2505_v3  ;;  %v2247_v4 = vpop.f32.mrf.mxu1 }
 0x216   : > { %v2332_v36 = vpop.f32.mrf.mxu2 }
 0x217   : > { %v2535_v54 = vmax.f32 %v2522_v21, 0.0  ;;  %v2363_v55 = vadd.f32 %v2332_v36, %v2238_v10  ;;  %v2593_v10 = vpop.permute.xlu0 %2592 }
 0x219   : > { %v2626_v47 = vmul.f32 %v2568_v27, %v2535_v54 }
 0x21a   : > { %v2181_v38 = vpop.f32.mrf.mxu0  ;;  %v2475_v41 = vpop.f32.mrf.mxu3 }
 0x21b   : > { %v2639_v45 = vpack.c.bf16 %v2626_v47, %v2626_v47  ;;  %v2506_v56 = vadd.f32 %v2475_v41, %v2363_v55  ;;  %v2243_v20 = vadd.f32 %v2242_v13, %v2181_v38 }
 0x21d   : > { %2652 = vst.msk [vmem:[%s3940_s28 + $0x4] sm:$0xf] %vm1401_vm6, %v2639_v45  ;;  %v2523_v44 = vadd.f32 %v3932_v40, %v2506_v56  ;;  %v2249_v61 = vpop.f32.mrf.mxu1 }
 0x21e   : > { %v2334_v17 = vpop.f32.mrf.mxu2 }
 0x21f   : > { %v2536_v7 = vmax.f32 %v2523_v44, 0.0  ;;  %v2364_v42 = vadd.f32 %v2334_v17, %v2240_v33  ;;  %v2598_v33 = vpop.permute.xlu1 %2597 }
 0x221   : > { %v2627_v46 = vmul.f32 %v2573_v62, %v2536_v7 }
 0x222   : > { %v2183_v18 = vpop.f32.mrf.mxu0  ;;  %v2477_v16 = vpop.f32.mrf.mxu3 }
 0x223   : > { %v2640_v30 = vpack.c.bf16 %v2627_v46, %v2627_v46  ;;  %v2507_v39 = vadd.f32 %v2477_v16, %v2364_v42  ;;  %v2245_v11 = vadd.f32 %v2244_v51, %v2183_v18 }
 0x225   : > { %2653 = vst.msk [vmem:[%s3940_s28 + $0x8] sm:$0xf] %vm1401_vm6, %v2640_v30  ;;  %v2524_v35 = vadd.f32 %v3932_v40, %v2507_v39  ;;  %v2252_v12 = vpop.f32.mrf.mxu1 }
 0x226   : > { %v2337_v37 = vpop.f32.mrf.mxu2 }
 0x227   : > { %v2537_v25 = vmax.f32 %v2524_v35, 0.0  ;;  %v2365_v28 = vadd.f32 %v2337_v37, %v2243_v20  ;;  %v2603_v20 = vpop.permute.xlu2 %2602 }
 0x229   : > { %v2628_v34 = vmul.f32 %v2578_v24, %v2537_v25 }
 0x22a   : > { %v2186_v57 = vpop.f32.mrf.mxu0  ;;  %v2480_v29 = vpop.f32.mrf.mxu3 }
 0x22b   : > { %v2641_v58 = vpack.c.bf16 %v2628_v34, %v2628_v34  ;;  %v2508_v6 = vadd.f32 %v2480_v29, %v2365_v28  ;;  %v2248_v9 = vadd.f32 %v2247_v4, %v2186_v57 }
 0x22d   : > { %2654 = vst.msk [vmem:[%s3940_s28 + $0xc] sm:$0xf] %vm1401_vm6, %v2641_v58  ;;  %v2525_v26 = vadd.f32 %v3932_v40, %v2508_v6  ;;  %v2254_v23 = vpop.f32.mrf.mxu1 }
 0x22e   : > { %v2339_v22 = vpop.f32.mrf.mxu2 }
 0x22f   : > { %v2538_v15 = vmax.f32 %v2525_v26, 0.0  ;;  %v2366_v52 = vadd.f32 %v2339_v22, %v2245_v11  ;;  %v2608_v22 = vpop.permute.xlu0 %2607 }
 0x231   : > { %v2629_v2 = vmul.f32 %v2583_v63, %v2538_v15 }
 0x232   : > { %v2188_v13 = vpop.f32.mrf.mxu0  ;;  %v2482_v1 = vpop.f32.mrf.mxu3 }
 0x233   : > { %v2642_v32 = vpack.c.bf16 %v2629_v2, %v2629_v2  ;;  %v2509_v0 = vadd.f32 %v2482_v1, %v2366_v52  ;;  %v2250_v21 = vadd.f32 %v2249_v61, %v2188_v13 }
 0x235   : > { %2655 = vst.msk [vmem:[%s3940_s28 + $0x10] sm:$0xf] %vm1401_vm6, %v2642_v32  ;;  %v2526_v60 = vadd.f32 %v3932_v40, %v2509_v0  ;;  %v2257_v50 = vpop.f32.mrf.mxu1 }
 0x236   : > { %v2342_v14 = vpop.f32.mrf.mxu2 }
 0x237   : > { %v2539_v8 = vmax.f32 %v2526_v60, 0.0  ;;  %v2367_v51 = vadd.f32 %v2342_v14, %v2248_v9  ;;  %v2613_v60 = vpop.permute.xlu1 %2612 }
 0x239   : > { %v2630_v59 = vmul.f32 %v2588_v43, %v2539_v8 }
 0x23a   : > { %v2191_v53 = vpop.f32.mrf.mxu0  ;;  %v2485_v48 = vpop.f32.mrf.mxu3 }
 0x23b   : > { %v2643_v19 = vpack.c.bf16 %v2630_v59, %v2630_v59  ;;  %v2510_v31 = vadd.f32 %v2485_v48, %v2367_v51  ;;  %v2253_v44 = vadd.f32 %v2252_v12, %v2191_v53 }
 0x23d   : > { %2656 = vst.msk [vmem:[%s3940_s28 + $0x14] sm:$0xf] %vm1401_vm6, %v2643_v19  ;;  %v2527_v5 = vadd.f32 %v3932_v40, %v2510_v31  ;;  %v2259_v49 = vpop.f32.mrf.mxu1  ;;  %v2618_v31 = vpop.permute.xlu2 %2617 }
 0x23e   : > { %v2344_v3 = vpop.f32.mrf.mxu2 }
 0x23f   : > { %v2540_v36 = vmax.f32 %v2527_v5, 0.0  ;;  %v2368_v4 = vadd.f32 %v2344_v3, %v2250_v21 }
 0x241   : > { %v2631_v54 = vmul.f32 %v2593_v10, %v2540_v36 }
 0x242   : > { %v2193_v27 = vpop.f32.mrf.mxu0  ;;  %v2487_v47 = vpop.f32.mrf.mxu3 }
 0x243   : > { %v2644_v55 = vpack.c.bf16 %v2631_v54, %v2631_v54  ;;  %v2511_v38 = vadd.f32 %v2487_v47, %v2368_v4  ;;  %v2255_v35 = vadd.f32 %v2254_v23, %v2193_v27  ;;  %v2623_v27 = vpop.permute.xlu0 %2622 }
 0x245   : > { %2657 = vst.msk [vmem:[%s3940_s28 + $0x18] sm:$0xf] %vm1401_vm6, %v2644_v55  ;;  %v2528_v41 = vadd.f32 %v3932_v40, %v2511_v38  ;;  %v2262_v45 = vpop.f32.mrf.mxu1 }
 0x246   : > { %v2347_v56 = vpop.f32.mrf.mxu2 }
 0x247   : > { %v2541_v17 = vmax.f32 %v2528_v41, 0.0  ;;  %v2369_v61 = vadd.f32 %v2347_v56, %v2253_v44 }
 0x249   : > { %v2632_v7 = vmul.f32 %v2598_v33, %v2541_v17 }
 0x24a   : > { %v2196_v62 = vpop.f32.mrf.mxu0  ;;  %v2490_v46 = vpop.f32.mrf.mxu3 }
 0x24b   : > { %v2645_v42 = vpack.c.bf16 %v2632_v7, %v2632_v7  ;;  %v2512_v18 = vadd.f32 %v2490_v46, %v2369_v61  ;;  %v2258_v6 = vadd.f32 %v2257_v50, %v2196_v62 }
 0x24d   : > { %2658 = vst.msk [vmem:[%s3940_s28 + $0x1c] sm:$0xf] %vm1401_vm6, %v2645_v42  ;;  %v2529_v16 = vadd.f32 %v3932_v40, %v2512_v18  ;;  %v2264_v30 = vpop.f32.mrf.mxu1 }
 0x24e   : > { %v2349_v39 = vpop.f32.mrf.mxu2 }
 0x24f   : > { %v2542_v37 = vmax.f32 %v2529_v16, 0.0  ;;  %v2370_v12 = vadd.f32 %v2349_v39, %v2255_v35 }
 0x251   : > { %v2633_v25 = vmul.f32 %v2603_v20, %v2542_v37 }
 0x252   : > { %v2198_v24 = vpop.f32.mrf.mxu0  ;;  %v2492_v34 = vpop.f32.mrf.mxu3 }
 0x253   : > { %v2646_v28 = vpack.c.bf16 %v2633_v25, %v2633_v25  ;;  %v2513_v57 = vadd.f32 %v2492_v34, %v2370_v12  ;;  %v2260_v32 = vadd.f32 %v2259_v49, %v2198_v24 }
 0x255   : > { %2659 = vst.msk [vmem:[%s3940_s28 + $0x20] sm:$0xf] %vm1401_vm6, %v2646_v28  ;;  %v2530_v29 = vadd.f32 %v3932_v40, %v2513_v57 }
 0x256   : > { %v2352_v58 = vpop.f32.mrf.mxu2 }
 0x257   : > { %v2543_v26 = vmax.f32 %v2530_v29, 0.0  ;;  %v2371_v15 = vadd.f32 %v2352_v58, %v2258_v6 }
 0x259   : > { %v2634_v11 = vmul.f32 %v2608_v22, %v2543_v26 }
 0x25a   : > { %v2201_v23 = vpop.f32.mrf.mxu0  ;;  %v2495_v63 = vpop.f32.mrf.mxu3 }
 0x25b   : > { %v2647_v2 = vpack.c.bf16 %v2634_v11, %v2634_v11  ;;  %v2514_v52 = vadd.f32 %v2495_v63, %v2371_v15  ;;  %v2263_v48 = vadd.f32 %v2262_v45, %v2201_v23 }
 0x25d   : > { %2660 = vst.msk [vmem:[%s3940_s28 + $0x24] sm:$0xf] %vm1401_vm6, %v2647_v2  ;;  %v2531_v13 = vadd.f32 %v3932_v40, %v2514_v52 }
 0x25e   : > { %v2354_v1 = vpop.f32.mrf.mxu2 }
 0x25f   : > { %v2544_v0 = vmax.f32 %v2531_v13, 0.0  ;;  %v2372_v9 = vadd.f32 %v2354_v1, %v2260_v32 }
 0x261   : > { %v2635_v14 = vmul.f32 %v2613_v60, %v2544_v0 }
 0x262   : > { %v2203_v50 = vpop.f32.mrf.mxu0  ;;  %v2497_v8 = vpop.f32.mrf.mxu3 }
 0x263   : > { %v2648_v43 = vpack.c.bf16 %v2635_v14, %v2635_v14  ;;  %v2515_v59 = vadd.f32 %v2497_v8, %v2372_v9 }
 0x265   : > { %2661 = vst.msk [vmem:[%s3940_s28 + $0x28] sm:$0xf] %vm1401_vm6, %v2648_v43  ;;  %v2532_v51 = vadd.f32 %v3932_v40, %v2515_v59 }
 0x266   : > { %v2357_v53 = vpop.f32.mrf.mxu2 }
 0x267   : > { %v2545_v19 = vmax.f32 %v2532_v51, 0.0  ;;  %v2373_v49 = vadd.f32 %v2357_v53, %v2263_v48 }
 0x269   : > { %v2636_v5 = vmul.f32 %v2618_v31, %v2545_v19 }
 0x26a   : > { %v2500_v3 = vpop.f32.mrf.mxu3 }
 0x26b   : > { %v2649_v21 = vpack.c.bf16 %v2636_v5, %v2636_v5  ;;  %v2516_v36 = vadd.f32 %v2500_v3, %v2373_v49 }
 0x26d   : > { %2662 = vst.msk [vmem:[%s3940_s28 + $0x2c] sm:$0xf] %vm1401_vm6, %v2649_v21  ;;  %v2533_v10 = vadd.f32 %v3932_v40, %v2516_v36 }
 0x26e   : > { %v2359_v54 = vpop.f32.mrf.mxu2 }
 0x26f   : > { %v2546_v4 = vmax.f32 %v2533_v10, 0.0 }
 0x271   : > { %v2637_v47 = vmul.f32 %v2623_v27, %v2546_v4 }
 0x272   : > { %v2502_v55 = vpop.f32.mrf.mxu3 }
 0x273   : > { %v2650_v38 = vpack.c.bf16 %v2637_v47, %v2637_v47 }
 0x275   : > { %2663 = vst.msk [vmem:[%s3940_s28 + $0x30] sm:$0xf] %vm1401_vm6, %v2650_v38 }
 0x276 PF: > { %s20_s30 = sadd.s32 1, %s3021_s30  }
 0x277   : > { %p17_p4 = scmp.ge.s32.totalorder %s20_s30, 4  }
 0x279   :  { %19 = sbr.rel (!%p17_p4) target bundleno = 1 (0x1), region = 94 }

</bundles_post_ra>
